<compile_context>
chip_gen: v7x
topology: tpu7x:2x2x1
jax: 0.10.0
libtpu: 0.0.40
codegen_flags: <defaults>
</compile_context>

<pallas_src>
import numpy as np

import jax
import jax.numpy as jnp
from jax import lax
from jax.experimental import pallas as pl
from jax.experimental.pallas import tpu as pltpu


# ----------------------------------------------------------------------------
# One-time parameter prep (hoisted out of the forward hot path)
# ----------------------------------------------------------------------------
def spectral_normalize(w, n_iter=30, eps=1e-12):
    """W / sigma_max(W.reshape(Cout, -1)) via converged power iteration."""
    wm = w.reshape(w.shape[0], -1).astype(jnp.float32)
    u0 = jax.random.normal(jax.random.PRNGKey(42), (wm.shape[0],), jnp.float32)
    u0 = u0 / (jnp.linalg.norm(u0) + eps)
    v0 = jnp.zeros((wm.shape[1],), jnp.float32)

    def body(_, uv):
        u, _ = uv
        v = wm.T @ u
        v = v / (jnp.linalg.norm(v) + eps)
        u = wm @ v
        u = u / (jnp.linalg.norm(u) + eps)
        return (u, v)

    u, v = lax.fori_loop(0, n_iter, body, (u0, v0))
    sigma = u @ (wm @ v)
    return w / sigma


def _make_row_select(bn, cin, h, ho, k=4, stride=2):
    """Constant 0/1 matrix selecting input rows 2*oh+i for every (i, ci, n, oh).

    Rows ordered (i, ci, n, oh); columns index the flattened (n, ci, h) rows of
    the layer input.  Applied as a left matmul inside the kernel (MXU-friendly,
    replaces any strided gather)."""
    m = np.zeros((k * cin * bn * ho, bn * cin * h), np.float32)
    for i in range(k):
        for c in range(cin):
            for n in range(bn):
                for oh in range(ho):
                    r = ((i * cin + c) * bn + n) * ho + oh
                    m[r, (n * cin + c) * h + stride * oh + i] = 1.0
    return jnp.asarray(m)


def _make_col_select(w_in, wo, k=4, stride=2):
    """S[w, ow, j] = 1 iff w == 2*ow + j  (stride-2 column gather as a tensor)."""
    s = np.zeros((w_in, wo, k), np.float32)
    for ow in range(wo):
        for j in range(k):
            s[stride * ow + j, ow, j] = 1.0
    return s


def _conv_lane_operator(w_sn, w_in, wo, channels_in_rows):
    """Fold the stride-2 column gather + conv weights into per-kernel-row matrices.

    channels_in_rows=True  (layer 1, raw NCHW input): G shape (4*Cin, W, Wo*Cout).
    channels_in_rows=False (layers 2/3, (h, w*C) activations): G shape (4, W*Cin, Wo*Cout).
    """
    cout, cin, kh, kw = w_sn.shape
    s = _make_col_select(w_in, wo, kw)
    if channels_in_rows:
        g = jnp.einsum('wpj,ckij->ikwpc', s, w_sn)          # (i, ci, w, ow, co)
        return g.reshape(kh * cin, w_in, wo * cout)
    g = jnp.einsum('wpj,ckij->iwkpc', s, w_sn)               # (i, w, ci, ow, co)
    return g.reshape(kh, w_in * cin, wo * cout)


def prepare_params(raw_params, batch, spatial):
    """Spectral-normalize weights and build all kernel constants (run once)."""
    (w1, b1), (w2, b2), (w3, b3) = raw_params
    c1 = w1.shape[1]
    assert w3.shape[0] == 1, "final conv must have Cout == 1"

    h1 = spatial
    h2 = (h1 - 4) // 2 + 1
    h3 = (h2 - 4) // 2 + 1
    h4 = (h3 - 4) // 2 + 1
    assert h4 == 1, "final conv must reduce to 1x1 for the fused scalar head"

    w1n = spectral_normalize(w1)
    w2n = spectral_normalize(w2)
    w3n = spectral_normalize(w3)

    # Layer 1 consumes the raw NCHW image reshaped (free) to (N*C*H, W):
    # rows = (n, ci, h), lanes = w.
    rs1 = _make_row_select(batch, c1, h1, h2)
    g1 = _conv_lane_operator(w1n, h1, h2, channels_in_rows=True)     # (4*C1, W1, Wo1*hid)
    br1 = jnp.tile(b1.astype(jnp.float32), h2)[None, :]              # (1, Wo1*hid)

    # Layers 2/3 consume (N*H, W*C) activations: rows = (n, h), lanes = (w, c).
    rs2 = _make_row_select(batch, 1, h2, h3)
    g2 = _conv_lane_operator(w2n, h2, h3, channels_in_rows=False)    # (4, W2*C2, Wo2*2hid)
    br2 = jnp.tile(b2.astype(jnp.float32), h3)[None, :]

    rs3 = _make_row_select(batch, 1, h3, h4)
    g3 = _conv_lane_operator(w3n, h3, h4, channels_in_rows=False)    # (4, W3*C3, 1)
    g3 = jnp.transpose(g3, (0, 2, 1))                                # (4, 1, W3*C3): VPU head
    br3 = b3.astype(jnp.float32).reshape(1, 1)

    params = (rs1, g1.astype(jnp.float32), br1,
              rs2, g2.astype(jnp.float32), br2,
              rs3, g3.astype(jnp.float32), br3)
    meta = dict(batch=batch,
                l1=(4 * c1, batch * h2),    # (row-blocks, output rows) per layer
                l2=(4, batch * h3))
    return params, meta


# ----------------------------------------------------------------------------
# Fused forward: one pallas_call, grid=(1,), all layers + activations in VMEM
# ----------------------------------------------------------------------------
def make_critic_forward(meta):
    bn = meta['batch']
    nb1, rows1 = meta['l1']
    nb2, rows2 = meta['l2']

    def kernel(x_ref, rs1, g1, b1, rs2, g2, b2, rs3, g3, b3, o_ref):
        def layer(a, rs_ref, g_ref, brow_ref, nb, rows):
            # Row gather (strided conv rows) as one constant 0/1 matmul ...
            bmat = jnp.dot(rs_ref[...], a, preferred_element_type=jnp.float32)
            # ... then accumulate over kernel-row (and, for layer 1, input-channel)
            # blocks against the precomputed conv lane operators.
            acc = jnp.zeros((rows, g_ref.shape[-1]), jnp.float32)
            for t in range(nb):
                acc = acc + jnp.dot(bmat[t * rows:(t + 1) * rows, :], g_ref[t],
                                    preferred_element_type=jnp.float32)
            acc = acc + brow_ref[...]                   # bias (tiled over ow in lanes)
            return jnp.maximum(acc, 0.2 * acc)          # LeakyReLU(0.2)

        a = x_ref[...].astype(jnp.float32)              # (N*C1*H1, W1) raw NCHW rows
        a = layer(a, rs1, g1, b1, nb1, rows1)           # conv1 + LeakyReLU (Dropout2d: identity)
        a = layer(a, rs2, g2, b2, nb2, rows2)           # conv2 + LeakyReLU (Dropout2d: identity)

        # conv3: Cout=1, 1x1 spatial output -> VPU mul + lane reduction head
        # (no 1/128-lane MXU tile, no extra launch).
        bmat = jnp.dot(rs3[...], a, preferred_element_type=jnp.float32)   # (4*N, W3*C3)
        acc = jnp.zeros((bn, 1), jnp.float32)
        for i in range(4):
            blk = bmat[i * bn:(i + 1) * bn, :]
            acc = acc + jnp.sum(blk * g3[i], axis=-1, keepdims=True)
        o_ref[...] = acc + b3[...]

    @jax.jit
    def forward(image, params):
        n, c, h, w = image.shape
        # Free reshape only — every transpose/gather happens inside the kernel.
        x2 = image.reshape(n * c * h, w)

        def full_spec(arr):
            return pl.BlockSpec(arr.shape, lambda b, _nd=arr.ndim: (0,) * _nd)

        in_specs = [pl.BlockSpec(x2.shape, lambda b: (0, 0))]
        in_specs += [full_spec(p) for p in params]

        return pl.pallas_call(
            kernel,
            out_shape=jax.ShapeDtypeStruct((n, 1), jnp.float32),
            grid=(1,),                                   # launch-overhead bound: one step
            in_specs=in_specs,
            out_specs=pl.BlockSpec((n, 1), lambda b: (0, 0)),
            compiler_params=pltpu.CompilerParams(
                dimension_semantics=("arbitrary",)),
        )(x2, *params)

    return forward


# ----------------------------------------------------------------------------
# Main
# ----------------------------------------------------------------------------
def _init_conv(key, cout, cin, k=4):
    kw_, kb_ = jax.random.split(key)
    fan_in = cin * k * k
    bound = 1.0 / np.sqrt(fan_in)
    w = jax.random.uniform(kw_, (cout, cin, k, k), jnp.float32, -bound, bound)
    b = jax.random.uniform(kb_, (cout,), jnp.float32, -bound, bound)
    return w, b


if __name__ == "__main__":
    hidden_dim = 16
    im_chan = 3
    batch, spatial = 2, 28      # 28 -> 13 -> 5 -> 1 with k=4, s=2

    key = jax.random.PRNGKey(0)
    k0, k1, k2, k3 = jax.random.split(key, 4)

    raw_params = (
        _init_conv(k1, hidden_dim, im_chan),
        _init_conv(k2, hidden_dim * 2, hidden_dim),
        _init_conv(k3, 1, hidden_dim * 2),
    )

    # One-time prep: spectral norm + gather/weight operator construction.
    params, meta = prepare_params(raw_params, batch=batch, spatial=spatial)
    params = jax.block_until_ready(params)

    forward = make_critic_forward(meta)

    image = jax.random.normal(k0, (batch, im_chan, spatial, spatial), jnp.float32)
    out = jax.block_until_ready(forward(image, params))
    assert out.shape == (batch, 1), out.shape
    print("KERNEL_OK")
</pallas_src>

<mosaic_0001>
module attributes {stable_mosaic.version = 11 : i64} {
  func.func @kernel(%arg0: i32, %arg1: memref<168x28xf32, #tpu.memory_space<vmem>>, %arg2: memref<312x168xf32, #tpu.memory_space<vmem>>, %arg3: memref<12x28x208xf32, #tpu.memory_space<vmem>>, %arg4: memref<1x208xf32, #tpu.memory_space<vmem>>, %arg5: memref<40x26xf32, #tpu.memory_space<vmem>>, %arg6: memref<4x208x160xf32, #tpu.memory_space<vmem>>, %arg7: memref<1x160xf32, #tpu.memory_space<vmem>>, %arg8: memref<8x10xf32, #tpu.memory_space<vmem>>, %arg9: memref<4x1x160xf32, #tpu.memory_space<vmem>>, %arg10: memref<1x1xf32, #tpu.memory_space<vmem>>, %arg11: memref<2x1xf32, #tpu.memory_space<vmem>>) attributes {dimension_semantics = [#tpu.dimension_semantics<arbitrary>], iteration_bounds = array<i64: 1>, scalar_prefetch = 0 : i64, scratch_operands = 0 : i64, tpu.core_type = #tpu.core_type<tc>, window_params = [{pipeline_mode = #tpu.pipeline_mode<synchronous>, transform_indices = @transform_0, window_bounds = array<i64: 168, 28>}, {pipeline_mode = #tpu.pipeline_mode<synchronous>, transform_indices = @transform_1, window_bounds = array<i64: 312, 168>}, {pipeline_mode = #tpu.pipeline_mode<synchronous>, transform_indices = @transform_2, window_bounds = array<i64: 12, 28, 208>}, {pipeline_mode = #tpu.pipeline_mode<synchronous>, transform_indices = @transform_3, window_bounds = array<i64: 1, 208>}, {pipeline_mode = #tpu.pipeline_mode<synchronous>, transform_indices = @transform_4, window_bounds = array<i64: 40, 26>}, {pipeline_mode = #tpu.pipeline_mode<synchronous>, transform_indices = @transform_5, window_bounds = array<i64: 4, 208, 160>}, {pipeline_mode = #tpu.pipeline_mode<synchronous>, transform_indices = @transform_6, window_bounds = array<i64: 1, 160>}, {pipeline_mode = #tpu.pipeline_mode<synchronous>, transform_indices = @transform_7, window_bounds = array<i64: 8, 10>}, {pipeline_mode = #tpu.pipeline_mode<synchronous>, transform_indices = @transform_8, window_bounds = array<i64: 4, 1, 160>}, {pipeline_mode = #tpu.pipeline_mode<synchronous>, transform_indices = @transform_9, window_bounds = array<i64: 1, 1>}, {pipeline_mode = #tpu.pipeline_mode<synchronous>, transform_indices = @transform_10, window_bounds = array<i64: 2, 1>}]} {
    %c0 = arith.constant 0 : index
    %c0_0 = arith.constant 0 : index
    %0 = vector.load %arg1[%c0, %c0_0] : memref<168x28xf32, #tpu.memory_space<vmem>>, vector<168x28xf32>
    %c0_1 = arith.constant 0 : index
    %c0_2 = arith.constant 0 : index
    %1 = vector.load %arg2[%c0_1, %c0_2] : memref<312x168xf32, #tpu.memory_space<vmem>>, vector<312x168xf32>
    %cst = arith.constant dense<0.000000e+00> : vector<312x28xf32>
    %2 = tpu.matmul %1, %0, %cst {dimension_numbers = #tpu.dot_dimension_numbers<[1], [0], [0], [1], [0, 0, 1, 1], [], []>} : vector<312x168xf32>, vector<168x28xf32>, vector<312x28xf32> -> vector<312x28xf32>
    %cst_3 = arith.constant 0.000000e+00 : f32
    %3 = vector.broadcast %cst_3 : f32 to vector<26x208xf32>
    %4 = vector.extract_strided_slice %2 {offsets = [0, 0], sizes = [26, 28], strides = [1, 1]} : vector<312x28xf32> to vector<26x28xf32>
    %c0_4 = arith.constant 0 : index
    %c0_5 = arith.constant 0 : index
    %c0_6 = arith.constant 0 : index
    %5 = vector.load %arg3[%c0_4, %c0_5, %c0_6] : memref<12x28x208xf32, #tpu.memory_space<vmem>>, vector<1x28x208xf32>
    %6 = vector.shape_cast %5 : vector<1x28x208xf32> to vector<28x208xf32>
    %cst_7 = arith.constant dense<0.000000e+00> : vector<26x208xf32>
    %7 = tpu.matmul %4, %6, %cst_7 {dimension_numbers = #tpu.dot_dimension_numbers<[1], [0], [0], [1], [0, 0, 1, 1], [], []>} : vector<26x28xf32>, vector<28x208xf32>, vector<26x208xf32> -> vector<26x208xf32>
    %8 = arith.addf %3, %7 : vector<26x208xf32>
    %9 = vector.extract_strided_slice %2 {offsets = [26, 0], sizes = [26, 28], strides = [1, 1]} : vector<312x28xf32> to vector<26x28xf32>
    %c1 = arith.constant 1 : index
    %c0_8 = arith.constant 0 : index
    %c0_9 = arith.constant 0 : index
    %10 = vector.load %arg3[%c1, %c0_8, %c0_9] : memref<12x28x208xf32, #tpu.memory_space<vmem>>, vector<1x28x208xf32>
    %11 = vector.shape_cast %10 : vector<1x28x208xf32> to vector<28x208xf32>
    %cst_10 = arith.constant dense<0.000000e+00> : vector<26x208xf32>
    %12 = tpu.matmul %9, %11, %cst_10 {dimension_numbers = #tpu.dot_dimension_numbers<[1], [0], [0], [1], [0, 0, 1, 1], [], []>} : vector<26x28xf32>, vector<28x208xf32>, vector<26x208xf32> -> vector<26x208xf32>
    %13 = arith.addf %8, %12 : vector<26x208xf32>
    %14 = vector.extract_strided_slice %2 {offsets = [52, 0], sizes = [26, 28], strides = [1, 1]} : vector<312x28xf32> to vector<26x28xf32>
    %c2 = arith.constant 2 : index
    %c0_11 = arith.constant 0 : index
    %c0_12 = arith.constant 0 : index
    %15 = vector.load %arg3[%c2, %c0_11, %c0_12] : memref<12x28x208xf32, #tpu.memory_space<vmem>>, vector<1x28x208xf32>
    %16 = vector.shape_cast %15 : vector<1x28x208xf32> to vector<28x208xf32>
    %cst_13 = arith.constant dense<0.000000e+00> : vector<26x208xf32>
    %17 = tpu.matmul %14, %16, %cst_13 {dimension_numbers = #tpu.dot_dimension_numbers<[1], [0], [0], [1], [0, 0, 1, 1], [], []>} : vector<26x28xf32>, vector<28x208xf32>, vector<26x208xf32> -> vector<26x208xf32>
    %18 = arith.addf %13, %17 : vector<26x208xf32>
    %19 = vector.extract_strided_slice %2 {offsets = [78, 0], sizes = [26, 28], strides = [1, 1]} : vector<312x28xf32> to vector<26x28xf32>
    %c3 = arith.constant 3 : index
    %c0_14 = arith.constant 0 : index
    %c0_15 = arith.constant 0 : index
    %20 = vector.load %arg3[%c3, %c0_14, %c0_15] : memref<12x28x208xf32, #tpu.memory_space<vmem>>, vector<1x28x208xf32>
    %21 = vector.shape_cast %20 : vector<1x28x208xf32> to vector<28x208xf32>
    %cst_16 = arith.constant dense<0.000000e+00> : vector<26x208xf32>
    %22 = tpu.matmul %19, %21, %cst_16 {dimension_numbers = #tpu.dot_dimension_numbers<[1], [0], [0], [1], [0, 0, 1, 1], [], []>} : vector<26x28xf32>, vector<28x208xf32>, vector<26x208xf32> -> vector<26x208xf32>
    %23 = arith.addf %18, %22 : vector<26x208xf32>
    %24 = vector.extract_strided_slice %2 {offsets = [104, 0], sizes = [26, 28], strides = [1, 1]} : vector<312x28xf32> to vector<26x28xf32>
    %c4 = arith.constant 4 : index
    %c0_17 = arith.constant 0 : index
    %c0_18 = arith.constant 0 : index
    %25 = vector.load %arg3[%c4, %c0_17, %c0_18] : memref<12x28x208xf32, #tpu.memory_space<vmem>>, vector<1x28x208xf32>
    %26 = vector.shape_cast %25 : vector<1x28x208xf32> to vector<28x208xf32>
    %cst_19 = arith.constant dense<0.000000e+00> : vector<26x208xf32>
    %27 = tpu.matmul %24, %26, %cst_19 {dimension_numbers = #tpu.dot_dimension_numbers<[1], [0], [0], [1], [0, 0, 1, 1], [], []>} : vector<26x28xf32>, vector<28x208xf32>, vector<26x208xf32> -> vector<26x208xf32>
    %28 = arith.addf %23, %27 : vector<26x208xf32>
    %29 = vector.extract_strided_slice %2 {offsets = [130, 0], sizes = [26, 28], strides = [1, 1]} : vector<312x28xf32> to vector<26x28xf32>
    %c5 = arith.constant 5 : index
    %c0_20 = arith.constant 0 : index
    %c0_21 = arith.constant 0 : index
    %30 = vector.load %arg3[%c5, %c0_20, %c0_21] : memref<12x28x208xf32, #tpu.memory_space<vmem>>, vector<1x28x208xf32>
    %31 = vector.shape_cast %30 : vector<1x28x208xf32> to vector<28x208xf32>
    %cst_22 = arith.constant dense<0.000000e+00> : vector<26x208xf32>
    %32 = tpu.matmul %29, %31, %cst_22 {dimension_numbers = #tpu.dot_dimension_numbers<[1], [0], [0], [1], [0, 0, 1, 1], [], []>} : vector<26x28xf32>, vector<28x208xf32>, vector<26x208xf32> -> vector<26x208xf32>
    %33 = arith.addf %28, %32 : vector<26x208xf32>
    %34 = vector.extract_strided_slice %2 {offsets = [156, 0], sizes = [26, 28], strides = [1, 1]} : vector<312x28xf32> to vector<26x28xf32>
    %c6 = arith.constant 6 : index
    %c0_23 = arith.constant 0 : index
    %c0_24 = arith.constant 0 : index
    %35 = vector.load %arg3[%c6, %c0_23, %c0_24] : memref<12x28x208xf32, #tpu.memory_space<vmem>>, vector<1x28x208xf32>
    %36 = vector.shape_cast %35 : vector<1x28x208xf32> to vector<28x208xf32>
    %cst_25 = arith.constant dense<0.000000e+00> : vector<26x208xf32>
    %37 = tpu.matmul %34, %36, %cst_25 {dimension_numbers = #tpu.dot_dimension_numbers<[1], [0], [0], [1], [0, 0, 1, 1], [], []>} : vector<26x28xf32>, vector<28x208xf32>, vector<26x208xf32> -> vector<26x208xf32>
    %38 = arith.addf %33, %37 : vector<26x208xf32>
    %39 = vector.extract_strided_slice %2 {offsets = [182, 0], sizes = [26, 28], strides = [1, 1]} : vector<312x28xf32> to vector<26x28xf32>
    %c7 = arith.constant 7 : index
    %c0_26 = arith.constant 0 : index
    %c0_27 = arith.constant 0 : index
    %40 = vector.load %arg3[%c7, %c0_26, %c0_27] : memref<12x28x208xf32, #tpu.memory_space<vmem>>, vector<1x28x208xf32>
    %41 = vector.shape_cast %40 : vector<1x28x208xf32> to vector<28x208xf32>
    %cst_28 = arith.constant dense<0.000000e+00> : vector<26x208xf32>
    %42 = tpu.matmul %39, %41, %cst_28 {dimension_numbers = #tpu.dot_dimension_numbers<[1], [0], [0], [1], [0, 0, 1, 1], [], []>} : vector<26x28xf32>, vector<28x208xf32>, vector<26x208xf32> -> vector<26x208xf32>
    %43 = arith.addf %38, %42 : vector<26x208xf32>
    %44 = vector.extract_strided_slice %2 {offsets = [208, 0], sizes = [26, 28], strides = [1, 1]} : vector<312x28xf32> to vector<26x28xf32>
    %c8 = arith.constant 8 : index
    %c0_29 = arith.constant 0 : index
    %c0_30 = arith.constant 0 : index
    %45 = vector.load %arg3[%c8, %c0_29, %c0_30] : memref<12x28x208xf32, #tpu.memory_space<vmem>>, vector<1x28x208xf32>
    %46 = vector.shape_cast %45 : vector<1x28x208xf32> to vector<28x208xf32>
    %cst_31 = arith.constant dense<0.000000e+00> : vector<26x208xf32>
    %47 = tpu.matmul %44, %46, %cst_31 {dimension_numbers = #tpu.dot_dimension_numbers<[1], [0], [0], [1], [0, 0, 1, 1], [], []>} : vector<26x28xf32>, vector<28x208xf32>, vector<26x208xf32> -> vector<26x208xf32>
    %48 = arith.addf %43, %47 : vector<26x208xf32>
    %49 = vector.extract_strided_slice %2 {offsets = [234, 0], sizes = [26, 28], strides = [1, 1]} : vector<312x28xf32> to vector<26x28xf32>
    %c9 = arith.constant 9 : index
    %c0_32 = arith.constant 0 : index
    %c0_33 = arith.constant 0 : index
    %50 = vector.load %arg3[%c9, %c0_32, %c0_33] : memref<12x28x208xf32, #tpu.memory_space<vmem>>, vector<1x28x208xf32>
    %51 = vector.shape_cast %50 : vector<1x28x208xf32> to vector<28x208xf32>
    %cst_34 = arith.constant dense<0.000000e+00> : vector<26x208xf32>
    %52 = tpu.matmul %49, %51, %cst_34 {dimension_numbers = #tpu.dot_dimension_numbers<[1], [0], [0], [1], [0, 0, 1, 1], [], []>} : vector<26x28xf32>, vector<28x208xf32>, vector<26x208xf32> -> vector<26x208xf32>
    %53 = arith.addf %48, %52 : vector<26x208xf32>
    %54 = vector.extract_strided_slice %2 {offsets = [260, 0], sizes = [26, 28], strides = [1, 1]} : vector<312x28xf32> to vector<26x28xf32>
    %c10 = arith.constant 10 : index
    %c0_35 = arith.constant 0 : index
    %c0_36 = arith.constant 0 : index
    %55 = vector.load %arg3[%c10, %c0_35, %c0_36] : memref<12x28x208xf32, #tpu.memory_space<vmem>>, vector<1x28x208xf32>
    %56 = vector.shape_cast %55 : vector<1x28x208xf32> to vector<28x208xf32>
    %cst_37 = arith.constant dense<0.000000e+00> : vector<26x208xf32>
    %57 = tpu.matmul %54, %56, %cst_37 {dimension_numbers = #tpu.dot_dimension_numbers<[1], [0], [0], [1], [0, 0, 1, 1], [], []>} : vector<26x28xf32>, vector<28x208xf32>, vector<26x208xf32> -> vector<26x208xf32>
    %58 = arith.addf %53, %57 : vector<26x208xf32>
    %59 = vector.extract_strided_slice %2 {offsets = [286, 0], sizes = [26, 28], strides = [1, 1]} : vector<312x28xf32> to vector<26x28xf32>
    %c11 = arith.constant 11 : index
    %c0_38 = arith.constant 0 : index
    %c0_39 = arith.constant 0 : index
    %60 = vector.load %arg3[%c11, %c0_38, %c0_39] : memref<12x28x208xf32, #tpu.memory_space<vmem>>, vector<1x28x208xf32>
    %61 = vector.shape_cast %60 : vector<1x28x208xf32> to vector<28x208xf32>
    %cst_40 = arith.constant dense<0.000000e+00> : vector<26x208xf32>
    %62 = tpu.matmul %59, %61, %cst_40 {dimension_numbers = #tpu.dot_dimension_numbers<[1], [0], [0], [1], [0, 0, 1, 1], [], []>} : vector<26x28xf32>, vector<28x208xf32>, vector<26x208xf32> -> vector<26x208xf32>
    %63 = arith.addf %58, %62 : vector<26x208xf32>
    %c0_41 = arith.constant 0 : index
    %c0_42 = arith.constant 0 : index
    %64 = vector.load %arg4[%c0_41, %c0_42] : memref<1x208xf32, #tpu.memory_space<vmem>>, vector<1x208xf32>
    %65 = vector.broadcast %64 : vector<1x208xf32> to vector<26x208xf32>
    %66 = arith.addf %63, %65 : vector<26x208xf32>
    %cst_43 = arith.constant 2.000000e-01 : f32
    %67 = vector.broadcast %cst_43 : f32 to vector<26x208xf32>
    %68 = arith.mulf %67, %66 : vector<26x208xf32>
    %69 = arith.maximumf %66, %68 : vector<26x208xf32>
    %c0_44 = arith.constant 0 : index
    %c0_45 = arith.constant 0 : index
    %70 = vector.load %arg5[%c0_44, %c0_45] : memref<40x26xf32, #tpu.memory_space<vmem>>, vector<40x26xf32>
    %cst_46 = arith.constant dense<0.000000e+00> : vector<40x208xf32>
    %71 = tpu.matmul %70, %69, %cst_46 {dimension_numbers = #tpu.dot_dimension_numbers<[1], [0], [0], [1], [0, 0, 1, 1], [], []>} : vector<40x26xf32>, vector<26x208xf32>, vector<40x208xf32> -> vector<40x208xf32>
    %cst_47 = arith.constant 0.000000e+00 : f32
    %72 = vector.broadcast %cst_47 : f32 to vector<10x160xf32>
    %73 = vector.extract_strided_slice %71 {offsets = [0, 0], sizes = [10, 208], strides = [1, 1]} : vector<40x208xf32> to vector<10x208xf32>
    %c0_48 = arith.constant 0 : index
    %c0_49 = arith.constant 0 : index
    %c0_50 = arith.constant 0 : index
    %74 = vector.load %arg6[%c0_48, %c0_49, %c0_50] : memref<4x208x160xf32, #tpu.memory_space<vmem>>, vector<1x208x160xf32>
    %75 = vector.shape_cast %74 : vector<1x208x160xf32> to vector<208x160xf32>
    %cst_51 = arith.constant dense<0.000000e+00> : vector<10x160xf32>
    %76 = tpu.matmul %73, %75, %cst_51 {dimension_numbers = #tpu.dot_dimension_numbers<[1], [0], [0], [1], [0, 0, 1, 1], [], []>} : vector<10x208xf32>, vector<208x160xf32>, vector<10x160xf32> -> vector<10x160xf32>
    %77 = arith.addf %72, %76 : vector<10x160xf32>
    %78 = vector.extract_strided_slice %71 {offsets = [10, 0], sizes = [10, 208], strides = [1, 1]} : vector<40x208xf32> to vector<10x208xf32>
    %c1_52 = arith.constant 1 : index
    %c0_53 = arith.constant 0 : index
    %c0_54 = arith.constant 0 : index
    %79 = vector.load %arg6[%c1_52, %c0_53, %c0_54] : memref<4x208x160xf32, #tpu.memory_space<vmem>>, vector<1x208x160xf32>
    %80 = vector.shape_cast %79 : vector<1x208x160xf32> to vector<208x160xf32>
    %cst_55 = arith.constant dense<0.000000e+00> : vector<10x160xf32>
    %81 = tpu.matmul %78, %80, %cst_55 {dimension_numbers = #tpu.dot_dimension_numbers<[1], [0], [0], [1], [0, 0, 1, 1], [], []>} : vector<10x208xf32>, vector<208x160xf32>, vector<10x160xf32> -> vector<10x160xf32>
    %82 = arith.addf %77, %81 : vector<10x160xf32>
    %83 = vector.extract_strided_slice %71 {offsets = [20, 0], sizes = [10, 208], strides = [1, 1]} : vector<40x208xf32> to vector<10x208xf32>
    %c2_56 = arith.constant 2 : index
    %c0_57 = arith.constant 0 : index
    %c0_58 = arith.constant 0 : index
    %84 = vector.load %arg6[%c2_56, %c0_57, %c0_58] : memref<4x208x160xf32, #tpu.memory_space<vmem>>, vector<1x208x160xf32>
    %85 = vector.shape_cast %84 : vector<1x208x160xf32> to vector<208x160xf32>
    %cst_59 = arith.constant dense<0.000000e+00> : vector<10x160xf32>
    %86 = tpu.matmul %83, %85, %cst_59 {dimension_numbers = #tpu.dot_dimension_numbers<[1], [0], [0], [1], [0, 0, 1, 1], [], []>} : vector<10x208xf32>, vector<208x160xf32>, vector<10x160xf32> -> vector<10x160xf32>
    %87 = arith.addf %82, %86 : vector<10x160xf32>
    %88 = vector.extract_strided_slice %71 {offsets = [30, 0], sizes = [10, 208], strides = [1, 1]} : vector<40x208xf32> to vector<10x208xf32>
    %c3_60 = arith.constant 3 : index
    %c0_61 = arith.constant 0 : index
    %c0_62 = arith.constant 0 : index
    %89 = vector.load %arg6[%c3_60, %c0_61, %c0_62] : memref<4x208x160xf32, #tpu.memory_space<vmem>>, vector<1x208x160xf32>
    %90 = vector.shape_cast %89 : vector<1x208x160xf32> to vector<208x160xf32>
    %cst_63 = arith.constant dense<0.000000e+00> : vector<10x160xf32>
    %91 = tpu.matmul %88, %90, %cst_63 {dimension_numbers = #tpu.dot_dimension_numbers<[1], [0], [0], [1], [0, 0, 1, 1], [], []>} : vector<10x208xf32>, vector<208x160xf32>, vector<10x160xf32> -> vector<10x160xf32>
    %92 = arith.addf %87, %91 : vector<10x160xf32>
    %c0_64 = arith.constant 0 : index
    %c0_65 = arith.constant 0 : index
    %93 = vector.load %arg7[%c0_64, %c0_65] : memref<1x160xf32, #tpu.memory_space<vmem>>, vector<1x160xf32>
    %94 = vector.broadcast %93 : vector<1x160xf32> to vector<10x160xf32>
    %95 = arith.addf %92, %94 : vector<10x160xf32>
    %cst_66 = arith.constant 2.000000e-01 : f32
    %96 = vector.broadcast %cst_66 : f32 to vector<10x160xf32>
    %97 = arith.mulf %96, %95 : vector<10x160xf32>
    %98 = arith.maximumf %95, %97 : vector<10x160xf32>
    %c0_67 = arith.constant 0 : index
    %c0_68 = arith.constant 0 : index
    %99 = vector.load %arg8[%c0_67, %c0_68] : memref<8x10xf32, #tpu.memory_space<vmem>>, vector<8x10xf32>
    %cst_69 = arith.constant dense<0.000000e+00> : vector<8x160xf32>
    %100 = tpu.matmul %99, %98, %cst_69 {dimension_numbers = #tpu.dot_dimension_numbers<[1], [0], [0], [1], [0, 0, 1, 1], [], []>} : vector<8x10xf32>, vector<10x160xf32>, vector<8x160xf32> -> vector<8x160xf32>
    %cst_70 = arith.constant 0.000000e+00 : f32
    %101 = vector.broadcast %cst_70 : f32 to vector<2x1xf32>
    %102 = vector.extract_strided_slice %100 {offsets = [0, 0], sizes = [2, 160], strides = [1, 1]} : vector<8x160xf32> to vector<2x160xf32>
    %c0_71 = arith.constant 0 : index
    %c0_72 = arith.constant 0 : index
    %c0_73 = arith.constant 0 : index
    %103 = vector.load %arg9[%c0_71, %c0_72, %c0_73] : memref<4x1x160xf32, #tpu.memory_space<vmem>>, vector<1x1x160xf32>
    %104 = vector.shape_cast %103 : vector<1x1x160xf32> to vector<1x160xf32>
    %105 = vector.broadcast %104 : vector<1x160xf32> to vector<2x160xf32>
    %106 = arith.mulf %102, %105 : vector<2x160xf32>
    %cst_74 = arith.constant dense<0.000000e+00> : vector<2xf32>
    %107 = vector.multi_reduction <add>, %106, %cst_74 [1] : vector<2x160xf32> to vector<2xf32>
    %108 = vector.shape_cast %107 : vector<2xf32> to vector<2x1xf32>
    %109 = arith.addf %101, %108 : vector<2x1xf32>
    %110 = vector.extract_strided_slice %100 {offsets = [2, 0], sizes = [2, 160], strides = [1, 1]} : vector<8x160xf32> to vector<2x160xf32>
    %c1_75 = arith.constant 1 : index
    %c0_76 = arith.constant 0 : index
    %c0_77 = arith.constant 0 : index
    %111 = vector.load %arg9[%c1_75, %c0_76, %c0_77] : memref<4x1x160xf32, #tpu.memory_space<vmem>>, vector<1x1x160xf32>
    %112 = vector.shape_cast %111 : vector<1x1x160xf32> to vector<1x160xf32>
    %113 = vector.broadcast %112 : vector<1x160xf32> to vector<2x160xf32>
    %114 = arith.mulf %110, %113 : vector<2x160xf32>
    %cst_78 = arith.constant dense<0.000000e+00> : vector<2xf32>
    %115 = vector.multi_reduction <add>, %114, %cst_78 [1] : vector<2x160xf32> to vector<2xf32>
    %116 = vector.shape_cast %115 : vector<2xf32> to vector<2x1xf32>
    %117 = arith.addf %109, %116 : vector<2x1xf32>
    %118 = vector.extract_strided_slice %100 {offsets = [4, 0], sizes = [2, 160], strides = [1, 1]} : vector<8x160xf32> to vector<2x160xf32>
    %c2_79 = arith.constant 2 : index
    %c0_80 = arith.constant 0 : index
    %c0_81 = arith.constant 0 : index
    %119 = vector.load %arg9[%c2_79, %c0_80, %c0_81] : memref<4x1x160xf32, #tpu.memory_space<vmem>>, vector<1x1x160xf32>
    %120 = vector.shape_cast %119 : vector<1x1x160xf32> to vector<1x160xf32>
    %121 = vector.broadcast %120 : vector<1x160xf32> to vector<2x160xf32>
    %122 = arith.mulf %118, %121 : vector<2x160xf32>
    %cst_82 = arith.constant dense<0.000000e+00> : vector<2xf32>
    %123 = vector.multi_reduction <add>, %122, %cst_82 [1] : vector<2x160xf32> to vector<2xf32>
    %124 = vector.shape_cast %123 : vector<2xf32> to vector<2x1xf32>
    %125 = arith.addf %117, %124 : vector<2x1xf32>
    %126 = vector.extract_strided_slice %100 {offsets = [6, 0], sizes = [2, 160], strides = [1, 1]} : vector<8x160xf32> to vector<2x160xf32>
    %c3_83 = arith.constant 3 : index
    %c0_84 = arith.constant 0 : index
    %c0_85 = arith.constant 0 : index
    %127 = vector.load %arg9[%c3_83, %c0_84, %c0_85] : memref<4x1x160xf32, #tpu.memory_space<vmem>>, vector<1x1x160xf32>
    %128 = vector.shape_cast %127 : vector<1x1x160xf32> to vector<1x160xf32>
    %129 = vector.broadcast %128 : vector<1x160xf32> to vector<2x160xf32>
    %130 = arith.mulf %126, %129 : vector<2x160xf32>
    %cst_86 = arith.constant dense<0.000000e+00> : vector<2xf32>
    %131 = vector.multi_reduction <add>, %130, %cst_86 [1] : vector<2x160xf32> to vector<2xf32>
    %132 = vector.shape_cast %131 : vector<2xf32> to vector<2x1xf32>
    %133 = arith.addf %125, %132 : vector<2x1xf32>
    %c0_87 = arith.constant 0 : index
    %c0_88 = arith.constant 0 : index
    %134 = vector.load %arg10[%c0_87, %c0_88] : memref<1x1xf32, #tpu.memory_space<vmem>>, vector<1x1xf32>
    %135 = vector.broadcast %134 : vector<1x1xf32> to vector<2x1xf32>
    %136 = arith.addf %133, %135 : vector<2x1xf32>
    %c0_89 = arith.constant 0 : index
    %c0_90 = arith.constant 0 : index
    %137 = vector.load %arg11[%c0_89, %c0_90] : memref<2x1xf32, #tpu.memory_space<vmem>>, vector<2x1xf32>
    tpu.vector_store %arg11[%c0_89, %c0_90], %136 {strides = array<i32>} : memref<2x1xf32, #tpu.memory_space<vmem>>, vector<2x1xf32>,
    return
  }
  func.func @transform_0(%arg0: i32) -> (i32, i32) {
    %c0_i32 = arith.constant 0 : i32
    %c0_i32_0 = arith.constant 0 : i32
    %c0_i32_1 = arith.constant 0 : i32
    return %c0_i32, %c0_i32_0 : i32, i32
  }
  func.func @transform_1(%arg0: i32) -> (i32, i32) {
    %c0_i32 = arith.constant 0 : i32
    %c0_i32_0 = arith.constant 0 : i32
    %c0_i32_1 = arith.constant 0 : i32
    return %c0_i32, %c0_i32_0 : i32, i32
  }
  func.func @transform_2(%arg0: i32) -> (i32, i32, i32) {
    %c0_i32 = arith.constant 0 : i32
    %c0_i32_0 = arith.constant 0 : i32
    %c0_i32_1 = arith.constant 0 : i32
    %c0_i32_2 = arith.constant 0 : i32
    return %c0_i32, %c0_i32_0, %c0_i32_1 : i32, i32, i32
  }
  func.func @transform_3(%arg0: i32) -> (i32, i32) {
    %c0_i32 = arith.constant 0 : i32
    %c0_i32_0 = arith.constant 0 : i32
    %c0_i32_1 = arith.constant 0 : i32
    return %c0_i32, %c0_i32_0 : i32, i32
  }
  func.func @transform_4(%arg0: i32) -> (i32, i32) {
    %c0_i32 = arith.constant 0 : i32
    %c0_i32_0 = arith.constant 0 : i32
    %c0_i32_1 = arith.constant 0 : i32
    return %c0_i32, %c0_i32_0 : i32, i32
  }
  func.func @transform_5(%arg0: i32) -> (i32, i32, i32) {
    %c0_i32 = arith.constant 0 : i32
    %c0_i32_0 = arith.constant 0 : i32
    %c0_i32_1 = arith.constant 0 : i32
    %c0_i32_2 = arith.constant 0 : i32
    return %c0_i32, %c0_i32_0, %c0_i32_1 : i32, i32, i32
  }
  func.func @transform_6(%arg0: i32) -> (i32, i32) {
    %c0_i32 = arith.constant 0 : i32
    %c0_i32_0 = arith.constant 0 : i32
    %c0_i32_1 = arith.constant 0 : i32
    return %c0_i32, %c0_i32_0 : i32, i32
  }
  func.func @transform_7(%arg0: i32) -> (i32, i32) {
    %c0_i32 = arith.constant 0 : i32
    %c0_i32_0 = arith.constant 0 : i32
    %c0_i32_1 = arith.constant 0 : i32
    return %c0_i32, %c0_i32_0 : i32, i32
  }
  func.func @transform_8(%arg0: i32) -> (i32, i32, i32) {
    %c0_i32 = arith.constant 0 : i32
    %c0_i32_0 = arith.constant 0 : i32
    %c0_i32_1 = arith.constant 0 : i32
    %c0_i32_2 = arith.constant 0 : i32
    return %c0_i32, %c0_i32_0, %c0_i32_1 : i32, i32, i32
  }
  func.func @transform_9(%arg0: i32) -> (i32, i32) {
    %c0_i32 = arith.constant 0 : i32
    %c0_i32_0 = arith.constant 0 : i32
    %c0_i32_1 = arith.constant 0 : i32
    return %c0_i32, %c0_i32_0 : i32, i32
  }
  func.func @transform_10(%arg0: i32) -> (i32, i32) {
    %c0_i32 = arith.constant 0 : i32
    %c0_i32_0 = arith.constant 0 : i32
    %c0_i32_1 = arith.constant 0 : i32
    return %c0_i32, %c0_i32_0 : i32, i32
  }
}

</mosaic_0001>

<bundles_post_ra>
// kernel: forward.1
= control target key start
LH: loop header
LB: loop body
LE: loop exit
PB: predicated region body
PF: predicated region fallthrough
CT: control target
= control target key end

     0   :  { %v3851_v0 = vmov 0.0|0.0   ;;  %v3852_v4 = vmov 0.0   ;;  %vm136_vm0 = vcmask 326656   ;;  %vm552_vm1 = vcmask 1043456   ;;  %s5607_s0 = inlined_call_operand.vmem [shape: f32[168,28], index: 0, kind: input, shape index: {}]   ;;  %s5608_s1 = inlined_call_operand.vmem [shape: f32[312,168], index: 1, kind: input, shape index: {}]   ;;  %s5609_s2 = inlined_call_operand.vmem [shape: f32[12,28,208], index: 2, kind: input, shape index: {}]   ;;  %s5610_s5 = inlined_call_operand.vmem [shape: f32[4,208,160], index: 5, kind: input, shape index: {}]   ;;  %s5611_s3 = inlined_call_operand.vmem [shape: f32[1,208], index: 3, kind: input, shape index: {}]   ;;  %s5612_s4 = inlined_call_operand.vmem [shape: f32[40,26], index: 4, kind: input, shape index: {}]   ;;  %s5613_s6 = inlined_call_operand.vmem [shape: f32[1,160], index: 6, kind: input, shape index: {}]   ;;  %s5614_s7 = inlined_call_operand.vmem [shape: f32[8,10], index: 7, kind: input, shape index: {}]   ;;  %s5615_s8 = inlined_call_operand.vmem [shape: f32[4,1,160], index: 8, kind: input, shape index: {}]   ;;  %s5616_s9 = inlined_call_operand.<no memory space> [shape: f32[1,1], index: 9, kind: input, shape index: {}]   ;;  %s5617_s10 = inlined_call_operand.vmem [shape: f32[2,1], index: 10, kind: output, shape index: {}]  }
   0x1   :  { %3374 = vmatprep.subr.bf16.mxu0 %v3851_v0  ;;  %v37_v1 = vld [vmem:[%s5607_s0] sm:$0xff]  ;;  %v38_v2 = vld [vmem:[%s5607_s0 + $0x8] sm:$0xff]  ;;  %v39_v3 = vld [vmem:[%s5607_s0 + $0x10] sm:$0xff]  ;;  %623 = vmatprep.mubr.f32.mxu1 %v3852_v4  ;;  %vm3853_vm2 = vmmov 1   ;;  %vm535_vm4 = vcmask 1045504   ;;  %vm543_vm5 = vcmask 228352  }
   0x2   :  { %v3375_v5 = vpack.c.bf16 %v38_v2, %v37_v1  ;;  %v40_v6 = vld [vmem:[%s5607_s0 + $0x18] sm:$0xff]  ;;  %v41_v8 = vld [vmem:[%s5607_s0 + $0x20] sm:$0xff]  ;;  %v42_v9 = vld [vmem:[%s5607_s0 + $0x28] sm:$0xff]  ;;  %vm896_vm6 = vcmask 1041408   ;;  %vm2084_vm8 = vcmask 211968   ;;  %vm2318_vm9 = vcmask 654336  }
   0x3   :  { %v3378_v7 = vpack.c.bf16 %v40_v6, %v39_v3  ;;  %v3381_v10 = vpack.c.bf16 %v42_v9, %v41_v8  ;;  %v59_v11 = vld [vmem:[%s5608_s1 + $0x8] sm:$0xff]  ;;  %v43_v12 = vld [vmem:[%s5607_s0 + $0x30] sm:$0xff]  ;;  %v44_v13 = vld [vmem:[%s5607_s0 + $0x38] sm:$0xff]  ;;  %vm2803_vm10 = vcmask 80896   ;;  %vm2920_vm11 = vcmask 1043458  }
   0x4   :  { %3376 = vmatpush1.bf16.msra.mxu0 %v3375_v5  ;;  %2997 = vmatprep.mubr.msk.f32.mxu0 %vm136_vm0, %v59_v11  ;;  %v3384_v14 = vpack.c.bf16 %v44_v13, %v43_v12  ;;  %v45_v15 = vld [vmem:[%s5607_s0 + $0x40] sm:$0xff]  ;;  %v46_v16 = vld [vmem:[%s5607_s0 + $0x48] sm:$0xff]  ;;  %v47_v18 = vld [vmem:[%s5607_s0 + $0x50] sm:$0xff]  ;;  %vm2922_vm12 = vcmask 257026   ;;  %vm2946_vm13 = vcmask 1045508   ;;  %vm2948_vm14 = vcmask 259076  }
   0x5   :  { %3377 = vmatprep.subr.bf16.mxu0 %v3851_v0  ;;  %v3387_v17 = vpack.c.bf16 %v46_v16, %v45_v15  ;;  %v48_v19 = vld [vmem:[%s5607_s0 + $0x58] sm:$0xff]  ;;  %v49_v21 = vld [vmem:[%s5607_s0 + $0x60] sm:$0xff]  ;;  %v50_v22 = vld [vmem:[%s5607_s0 + $0x68] sm:$0xff]  ;;  %vm2899_vm15 = vcmask 254976  }
   0x6   :  { %v3390_v20 = vpack.c.bf16 %v48_v19, %v47_v18  ;;  %v3393_v23 = vpack.c.bf16 %v50_v22, %v49_v21  ;;  %v51_v24 = vld [vmem:[%s5607_s0 + $0x70] sm:$0xff]  ;;  %v52_v25 = vld [vmem:[%s5607_s0 + $0x78] sm:$0xff]  ;;  %v53_v27 = vld [vmem:[%s5607_s0 + $0x80] sm:$0xff] }
   0x7   :  { %v3396_v26 = vpack.c.bf16 %v52_v25, %v51_v24  ;;  %v54_v28 = vld [vmem:[%s5607_s0 + $0x88] sm:$0xff]  ;;  %v55_v30 = vld [vmem:[%s5607_s0 + $0x90] sm:$0xff]  ;;  %v56_v31 = vld [vmem:[%s5607_s0 + $0x98] sm:$0xff] }
   0x8   :  { %3379 = vmatpush1.bf16.msra.mxu0 %v3378_v7  ;;  %v3399_v29 = vpack.c.bf16 %v54_v28, %v53_v27  ;;  %v3402_v32 = vpack.c.bf16 %v56_v31, %v55_v30  ;;  %v57_v33 = vld [vmem:[%s5607_s0 + $0xa0] sm:$0xff]  ;;  %v61_v35 = vld [vmem:[%s5608_s1 + $0x18] sm:$0xff]  ;;  %v60_v36 = vld [vmem:[%s5608_s1 + $0x10] sm:$0xff] }
   0x9   :  { %3380 = vmatprep.subr.bf16.mxu0 %v3851_v0  ;;  %v58_v34 = vld [vmem:[%s5608_s1] sm:$0xff]  ;;  %v63_v37 = vld [vmem:[%s5608_s1 + $0x28] sm:$0xff]  ;;  %v65_v39 = vld [vmem:[%s5608_s1 + $0x38] sm:$0xff] }
   0xa   :  { %v62_v38 = vld [vmem:[%s5608_s1 + $0x20] sm:$0xff]  ;;  %v64_v40 = vld [vmem:[%s5608_s1 + $0x30] sm:$0xff]  ;;  %v67_v41 = vld [vmem:[%s5608_s1 + $0x48] sm:$0xff] }
   0xb   :  { %v66_v42 = vld [vmem:[%s5608_s1 + $0x40] sm:$0xff]  ;;  %v69_v43 = vld [vmem:[%s5608_s1 + $0x58] sm:$0xff]  ;;  %v68_v44 = vld [vmem:[%s5608_s1 + $0x50] sm:$0xff] }
   0xc   :  { %3382 = vmatpush1.bf16.msra.mxu0 %v3381_v10  ;;  %v71_v45 = vld [vmem:[%s5608_s1 + $0x68] sm:$0xff]  ;;  %v70_v46 = vld [vmem:[%s5608_s1 + $0x60] sm:$0xff]  ;;  %v73_v47 = vld [vmem:[%s5608_s1 + $0x78] sm:$0xff] }
   0xd   :  { %3383 = vmatprep.subr.bf16.mxu0 %v3851_v0  ;;  %v72_v48 = vld [vmem:[%s5608_s1 + $0x70] sm:$0xff]  ;;  %v75_v49 = vld [vmem:[%s5608_s1 + $0x88] sm:$0xff]  ;;  %v74_v50 = vld [vmem:[%s5608_s1 + $0x80] sm:$0xff] }
   0xe   :  { %v77_v51 = vld [vmem:[%s5608_s1 + $0x98] sm:$0xff]  ;;  %v76_v52 = vld [vmem:[%s5608_s1 + $0x90] sm:$0xff]  ;;  %v79_v53 = vld [vmem:[%s5608_s1 + $0xa8] sm:$0xff] }
   0xf   :  { %v78_v54 = vld [vmem:[%s5608_s1 + $0xa0] sm:$0xff]  ;;  %v81_v55 = vld [vmem:[%s5608_s1 + $0xb8] sm:$0xff]  ;;  %v80_v56 = vld [vmem:[%s5608_s1 + $0xb0] sm:$0xff] }
  0x10   :  { %3385 = vmatpush1.bf16.msra.mxu0 %v3384_v14  ;;  %v83_v57 = vld [vmem:[%s5608_s1 + $0xc8] sm:$0xff]  ;;  %v82_v58 = vld [vmem:[%s5608_s1 + $0xc0] sm:$0xff]  ;;  %v85_v59 = vld [vmem:[%s5608_s1 + $0xd8] sm:$0xff] }
  0x11   :  { %3386 = vmatprep.subr.bf16.mxu0 %v3851_v0  ;;  %v84_v60 = vld [vmem:[%s5608_s1 + $0xd0] sm:$0xff]  ;;  %v87_v61 = vld [vmem:[%s5608_s1 + $0xe8] sm:$0xff]  ;;  %v86_v62 = vld [vmem:[%s5608_s1 + $0xe0] sm:$0xff] }
  0x12   :  { %v89_v63 = vld [vmem:[%s5608_s1 + $0xf8] sm:$0xff]  ;;  %v91_v1 = vld [vmem:[%s5608_s1 + $0x108] sm:$0xff]  ;;  %v90_v2 = vld [vmem:[%s5608_s1 + $0x100] sm:$0xff] }
  0x13   :  { %v93_v3 = vld [vmem:[%s5608_s1 + $0x118] sm:$0xff]  ;;  %v92_v5 = vld [vmem:[%s5608_s1 + $0x110] sm:$0xff]  ;;  %v95_v6 = vld [vmem:[%s5608_s1 + $0x128] sm:$0xff] }
  0x14   :  { %3388 = vmatpush1.bf16.msra.mxu0 %v3387_v17  ;;  %v94_v7 = vld [vmem:[%s5608_s1 + $0x120] sm:$0xff]  ;;  %v97_v8 = vld [vmem:[%s5608_s1 + $0x138] sm:$0xff]  ;;  %v96_v9 = vld [vmem:[%s5608_s1 + $0x130] sm:$0xff] }
  0x15   :  { %3389 = vmatprep.subr.bf16.mxu0 %v3851_v0  ;;  %v99_v10 = vld [vmem:[%s5608_s1 + $0x148] sm:$0xff]  ;;  %v98_v11 = vld [vmem:[%s5608_s1 + $0x140] sm:$0xff]  ;;  %v101_v12 = vld [vmem:[%s5608_s1 + $0x158] sm:$0xff] }
  0x16   :  { %v100_v13 = vld [vmem:[%s5608_s1 + $0x150] sm:$0xff]  ;;  %v103_v14 = vld [vmem:[%s5608_s1 + $0x168] sm:$0xff]  ;;  %v102_v15 = vld [vmem:[%s5608_s1 + $0x160] sm:$0xff] }
  0x17   :  { %v105_v16 = vld [vmem:[%s5608_s1 + $0x178] sm:$0xff]  ;;  %v104_v17 = vld [vmem:[%s5608_s1 + $0x170] sm:$0xff]  ;;  %v107_v18 = vld [vmem:[%s5608_s1 + $0x188] sm:$0xff] }
  0x18   :  { %3391 = vmatpush1.bf16.msra.mxu0 %v3390_v20  ;;  %v3037_v19 = vld [vmem:[%s5609_s2 + $0x48] sm:$0xff]  ;;  %v3039_v20 = vld [vmem:[%s5609_s2 + $0x58] sm:$0xff]  ;;  %v106_v21 = vld [vmem:[%s5608_s1 + $0x180] sm:$0xff] }
  0x19   :  { %3392 = vmatprep.subr.bf16.mxu0 %v3851_v0  ;;  %v3404_v22 = vpack.c.bf16 %v3039_v20, %v3037_v19  ;;  %v3038_v24 = vld [vmem:[%s5609_s2 + $0x50] sm:$0xff]  ;;  %v109_v25 = vld [vmem:[%s5608_s1 + $0x198] sm:$0xff]  ;;  %v3041_v27 = vld [vmem:[%s5609_s2 + $0x68] sm:$0xff] }
  0x1a   :  { %v3043_v28 = vld [vmem:[%s5609_s2 + $0x78] sm:$0xf]  ;;  %v3040_v31 = vld [vmem:[%s5609_s2 + $0x60] sm:$0xff]  ;;  %vm4185_vm3 = vmpackc.low %vm552_vm1, %vm3853_vm2 }
  0x1b   :  { %3405 = vmatprep.subr.bf16.mxu1 %v3404_v22  ;;  %v3408_v30 = vpack.c.bf16 %v3043_v28, %v3041_v27  ;;  %v518_v19 = vld [vmem:[%s5609_s2 + $0x20] sm:$0xff]  ;;  %v520_v20 = vld [vmem:[%s5609_s2 + $0x30] sm:$0xf]  ;;  %v3057_v22 = vld [vmem:[%s5609_s2 + $0x88] sm:$0xff] }
  0x1c   :  { %3394 = vmatpush1.bf16.msra.mxu0 %v3393_v23  ;;  %v3036_v23 = vld [vmem:[%s5609_s2 + $0x40] sm:$0xff]  ;;  %v3421_v27 = vpack.c.bf16 %v520_v20, %v518_v19  ;;  %v3087_v19 = vld [vmem:[%s5609_s2 + $0x118] sm:$0xff]  ;;  %vm4992_vm7 = vmpackc.low %vm896_vm6, %vm3853_vm2  ;;  %vm2991_vm2 = vcmask 1024  }
  0x1d   :  { %3395 = vmatprep.subr.bf16.mxu0 %v3851_v0 }
  0x20   :  { %3397 = vmatpush1.bf16.msra.mxu0 %v3396_v26  ;;  %v3406_v26 = vpack.c.bf16 %v3038_v24, %v3036_v23  ;;  %v3059_v23 = vld [vmem:[%s5609_s2 + $0x98] sm:$0xff] }
  0x21   :  { %3398 = vmatprep.subr.bf16.mxu0 %v3851_v0  ;;  %v3424_v28 = vpack.c.bf16 %v3059_v23, %v3057_v22 }
  0x22   :  { %3407 = vmatpush1.bf16.msra.mxu1 %v3406_v26 }
  0x23   :  { %3410 = vmatprep.subr.msk.bf16.mxu1 %vm4185_vm3, %v3408_v30 }
  0x24   :  { %3400 = vmatpush1.bf16.msra.mxu0 %v3399_v29  ;;  %v108_v29 = vld [vmem:[%s5608_s1 + $0x190] sm:$0xff] }
  0x25   :  { %3401 = vmatprep.subr.bf16.mxu0 %v3851_v0  ;;  %v88_v0 = vld [vmem:[%s5608_s1 + $0xf0] sm:$0xff] }
  0x28   :  { %3403 = vmatpush1.bf16.msra.mxu0 %v3402_v32  ;;  %v3042_v32 = vld [vmem:[%s5609_s2 + $0x70] sm:$0xf] }
  0x29   :  { %294 = vmatprep.subr.mxu0 %v3852_v4 }
  0x2c   :  { %295 = vmatpush1.msra.mxu0 %v57_v33  ;;  %v111_v33 = vld [vmem:[%s5608_s1 + $0x1a8] sm:$0xff] }
  0x2d   :  { %319 = vmatmul.mubr.f32.vlgmr.msra.gmra.mrb[0].mxu0 %v58_v34  ;;  %v3260_v34 = vld [vmem:[%s5610_s5 + $0x348] sm:$0xff] }
  0x2e   :  { %2998 = vmatprep.mubr.msk.f32.mxu0 %vm136_vm0, %v61_v35  ;;  %v3411_v35 = vpack.c.bf16 %v3042_v32, %v3040_v31 }
  0x30   :  { %3413 = vmatpush1.bf16.msk.msra.mxu1 %vm4185_vm3, %v3411_v35 }
  0x31   :  { %324 = vmatmul.mubr.f32.gmra.mrb[2].mxu0 %v60_v36  ;;  %v110_v36 = vld [vmem:[%s5608_s1 + $0x1a0] sm:$0xff] }
  0x32   :  { %2999 = vmatprep.mubr.msk.f32.mxu0 %vm136_vm0, %v63_v37  ;;  %v113_v37 = vld [vmem:[%s5608_s1 + $0x1b8] sm:$0xff] }
  0x35   :  { %329 = vmatmul.mubr.f32.gmra.mrb[4].mxu0 %v62_v38  ;;  %v112_v38 = vld [vmem:[%s5608_s1 + $0x1b0] sm:$0xff] }
  0x36   :  { %3000 = vmatprep.mubr.msk.f32.mxu0 %vm136_vm0, %v65_v39  ;;  %v115_v39 = vld [vmem:[%s5608_s1 + $0x1c8] sm:$0xff] }
  0x39   :  { %334 = vmatmul.mubr.f32.gmra.mrb[6].mxu0 %v64_v40  ;;  %v515_v40 = vld [vmem:[%s5609_s2 + $0x8] sm:$0xff] }
  0x3a   :  { %3001 = vmatprep.mubr.msk.f32.mxu0 %vm136_vm0, %v67_v41  ;;  %v517_v41 = vld [vmem:[%s5609_s2 + $0x18] sm:$0xff] }
  0x3d   :  { %339 = vmatmul.mubr.f32.gmra.mrb[8].mxu0 %v66_v42  ;;  %v114_v42 = vld [vmem:[%s5608_s1 + $0x1c0] sm:$0xff] }
  0x3e   :  { %3002 = vmatprep.mubr.msk.f32.mxu0 %vm136_vm0, %v69_v43  ;;  %v3414_v43 = vpack.c.bf16 %v517_v41, %v515_v40  ;;  %v3058_v40 = vld [vmem:[%s5609_s2 + $0x90] sm:$0xff] }
  0x40   :  { %3415 = vmatprep.subr.bf16.mxu1 %v3414_v43  ;;  %v3063_v43 = vld [vmem:[%s5609_s2 + $0xb8] sm:$0xf] }
  0x41   :  { %344 = vmatmul.mubr.f32.gmra.mrb[10].mxu0 %v68_v44  ;;  %v117_v44 = vld [vmem:[%s5608_s1 + $0x1d8] sm:$0xff] }
  0x42   :  { %3003 = vmatprep.mubr.msk.f32.mxu0 %vm136_vm0, %v71_v45  ;;  %v116_v45 = vld [vmem:[%s5608_s1 + $0x1d0] sm:$0xff] }
  0x45   :  { %349 = vmatmul.mubr.f32.gmra.mrb[12].mxu0 %v70_v46  ;;  %v119_v46 = vld [vmem:[%s5608_s1 + $0x1e8] sm:$0xff] }
  0x46   :  { %3004 = vmatprep.mubr.msk.f32.mxu0 %vm136_vm0, %v73_v47  ;;  %v118_v47 = vld [vmem:[%s5608_s1 + $0x1e0] sm:$0xff] }
  0x49   :  { %354 = vmatmul.mubr.f32.gmra.mrb[14].mxu0 %v72_v48  ;;  %v121_v48 = vld [vmem:[%s5608_s1 + $0x1f8] sm:$0xff] }
  0x4a   :  { %3005 = vmatprep.mubr.msk.f32.mxu0 %vm136_vm0, %v75_v49  ;;  %v120_v49 = vld [vmem:[%s5608_s1 + $0x1f0] sm:$0xff] }
  0x4d   :  { %359 = vmatmul.mubr.f32.gmra.mrb[16].mxu0 %v74_v50  ;;  %v123_v50 = vld [vmem:[%s5608_s1 + $0x208] sm:$0xff] }
  0x4e   :  { %3006 = vmatprep.mubr.msk.f32.mxu0 %vm136_vm0, %v77_v51  ;;  %v122_v51 = vld [vmem:[%s5608_s1 + $0x200] sm:$0xff] }
  0x51   :  { %364 = vmatmul.mubr.f32.gmra.mrb[18].mxu0 %v76_v52  ;;  %v125_v52 = vld [vmem:[%s5608_s1 + $0x218] sm:$0xff] }
  0x52   :  { %3007 = vmatprep.mubr.msk.f32.mxu0 %vm136_vm0, %v79_v53  ;;  %v124_v53 = vld [vmem:[%s5608_s1 + $0x210] sm:$0xff] }
  0x55   :  { %369 = vmatmul.mubr.f32.gmra.mrb[20].mxu0 %v78_v54  ;;  %v127_v54 = vld [vmem:[%s5608_s1 + $0x228] sm:$0xff] }
  0x56   :  { %3008 = vmatprep.mubr.msk.f32.mxu0 %vm136_vm0, %v81_v55  ;;  %v126_v55 = vld [vmem:[%s5608_s1 + $0x220] sm:$0xff] }
  0x59   :  { %374 = vmatmul.mubr.f32.gmra.mrb[22].mxu0 %v80_v56  ;;  %v129_v56 = vld [vmem:[%s5608_s1 + $0x238] sm:$0xff] }
  0x5a   :  { %3009 = vmatprep.mubr.msk.f32.mxu0 %vm136_vm0, %v83_v57  ;;  %v128_v57 = vld [vmem:[%s5608_s1 + $0x230] sm:$0xff] }
  0x5d   :  { %379 = vmatmul.mubr.f32.gmra.mrb[24].mxu0 %v82_v58  ;;  %v131_v58 = vld [vmem:[%s5608_s1 + $0x248] sm:$0xff] }
  0x5e   :  { %3010 = vmatprep.mubr.msk.f32.mxu0 %vm136_vm0, %v85_v59  ;;  %v130_v59 = vld [vmem:[%s5608_s1 + $0x240] sm:$0xff] }
  0x61   :  { %384 = vmatmul.mubr.f32.gmra.mrb[26].mxu0 %v84_v60  ;;  %v133_v60 = vld [vmem:[%s5608_s1 + $0x258] sm:$0xff] }
  0x62   :  { %3011 = vmatprep.mubr.msk.f32.mxu0 %vm136_vm0, %v87_v61  ;;  %v132_v61 = vld [vmem:[%s5608_s1 + $0x250] sm:$0xff] }
  0x65   :  { %389 = vmatmul.mubr.f32.gmra.mrb[28].mxu0 %v86_v62  ;;  %v135_v62 = vld [vmem:[%s5608_s1 + $0x268] sm:$0xff] }
  0x66   :  { %3012 = vmatprep.mubr.msk.f32.mxu0 %vm136_vm0, %v89_v63  ;;  %v134_v63 = vld [vmem:[%s5608_s1 + $0x260] sm:$0xff] }
  0x69   :  { %394 = vmatmul.mubr.f32.gmra.mrb[30].mxu0 %v88_v0 }
  0x6a   :  { %3013 = vmatprep.mubr.msk.f32.mxu0 %vm136_vm0, %v91_v1 }
  0x6d   :  { %399 = vmatmul.mubr.f32.gmra.mrb[32].mxu0 %v90_v2 }
  0x6e   :  { %3014 = vmatprep.mubr.msk.f32.mxu0 %vm136_vm0, %v93_v3 }
  0x71   :  { %404 = vmatmul.mubr.f32.gmra.mrb[34].mxu0 %v92_v5 }
  0x72   :  { %3015 = vmatprep.mubr.msk.f32.mxu0 %vm136_vm0, %v95_v6 }
  0x75   :  { %409 = vmatmul.mubr.f32.gmra.mrb[36].mxu0 %v94_v7 }
  0x76   :  { %3016 = vmatprep.mubr.msk.f32.mxu0 %vm136_vm0, %v97_v8 }
  0x79   :  { %414 = vmatmul.mubr.f32.gmra.mrb[38].mxu0 %v96_v9  ;;  %v514_v9 = vld [vmem:[%s5609_s2] sm:$0xff] }
  0x7a   :  { %3017 = vmatprep.mubr.msk.f32.mxu0 %vm136_vm0, %v99_v10  ;;  %v516_v10 = vld [vmem:[%s5609_s2 + $0x10] sm:$0xff] }
  0x7d   :  { %419 = vmatmul.mubr.f32.gmra.mrb[40].mxu0 %v98_v11  ;;  %v519_v11 = vld [vmem:[%s5609_s2 + $0x28] sm:$0xff] }
  0x7e   :  { %3018 = vmatprep.mubr.msk.f32.mxu0 %vm136_vm0, %v101_v12  ;;  %v521_v12 = vld [vmem:[%s5609_s2 + $0x38] sm:$0xf] }
  0x81   :  { %424 = vmatmul.mubr.f32.gmra.mrb[42].mxu0 %v100_v13 }
  0x82   :  { %3019 = vmatprep.mubr.msk.f32.mxu0 %vm136_vm0, %v103_v14 }
  0x85   :  { %429 = vmatmul.mubr.f32.gmra.mrb[44].mxu0 %v102_v15 }
  0x86   :  { %3020 = vmatprep.mubr.msk.f32.mxu0 %vm136_vm0, %v105_v16 }
  0x89   :  { %434 = vmatmul.mubr.f32.gmra.mrb[46].mxu0 %v104_v17  ;;  %v3416_v17 = vpack.c.bf16 %v516_v10, %v514_v9  ;;  %v3075_v9 = vld [vmem:[%s5609_s2 + $0xe8] sm:$0xff] }
  0x8a   :  { %3021 = vmatprep.mubr.msk.f32.mxu0 %vm136_vm0, %v107_v18  ;;  %v3418_v18 = vpack.c.bf16 %v521_v12, %v519_v11 }
  0x8d   :  { %439 = vmatmul.mubr.f32.gmra.mrb[48].mxu0 %v106_v21 }
  0x8e   :  { %3022 = vmatprep.mubr.msk.f32.mxu0 %vm136_vm0, %v109_v25 }
  0x91   :  { %444 = vmatmul.mubr.f32.gmra.mrb[50].mxu0 %v108_v29 }
  0x92   :  { %3023 = vmatprep.mubr.msk.f32.mxu0 %vm136_vm0, %v111_v33 }
  0x95   :  { %449 = vmatmul.mubr.f32.gmra.mrb[52].mxu0 %v110_v36 }
  0x96   :  { %3024 = vmatprep.mubr.msk.f32.mxu0 %vm136_vm0, %v113_v37 }
  0x99   :  { %454 = vmatmul.mubr.f32.gmra.mrb[54].mxu0 %v112_v38 }
  0x9a   :  { %3025 = vmatprep.mubr.msk.f32.mxu0 %vm136_vm0, %v115_v39  ;;  %v3056_v39 = vld [vmem:[%s5609_s2 + $0x80] sm:$0xff] }
  0x9d   :  { %459 = vmatmul.mubr.f32.gmra.mrb[56].mxu0 %v114_v42  ;;  %v3061_v42 = vld [vmem:[%s5609_s2 + $0xa8] sm:$0xff] }
  0x9e   :  { %3026 = vmatprep.mubr.msk.f32.mxu0 %vm136_vm0, %v117_v44 }
  0xa1   :  { %464 = vmatmul.mubr.f32.gmra.mrb[58].mxu0 %v116_v45  ;;  %v3426_v45 = vpack.c.bf16 %v3058_v40, %v3056_v39  ;;  %v3099_v40 = vld [vmem:[%s5609_s2 + $0x148] sm:$0xff] }
  0xa2   :  { %3027 = vmatprep.mubr.msk.f32.mxu0 %vm136_vm0, %v119_v46 }
  0xa5   :  { %469 = vmatmul.mubr.f32.gmra.mrb[60].mxu0 %v118_v47 }
  0xa6   :  { %3028 = vmatprep.mubr.msk.f32.mxu0 %vm136_vm0, %v121_v48  ;;  %v3428_v48 = vpack.c.bf16 %v3063_v43, %v3061_v42 }
  0xa9   :  { %474 = vmatmul.mubr.f32.gmra.mrb[62].mxu0 %v120_v49  ;;  %v3060_v49 = vld [vmem:[%s5609_s2 + $0xa0] sm:$0xff] }
  0xaa   :  { %3029 = vmatprep.mubr.msk.f32.mxu0 %vm136_vm0, %v123_v50  ;;  %v3062_v50 = vld [vmem:[%s5609_s2 + $0xb0] sm:$0xf] }
  0xad   :  { %479 = vmatmul.mubr.f32.gmra.mrb[64].mxu0 %v122_v51 }
  0xae   :  { %3030 = vmatprep.mubr.msk.f32.mxu0 %vm136_vm0, %v125_v52  ;;  %v3071_v52 = vld [vmem:[%s5609_s2 + $0xc8] sm:$0xff] }
  0xb1   :  { %484 = vmatmul.mubr.f32.gmra.mrb[66].mxu0 %v124_v53  ;;  %v3073_v53 = vld [vmem:[%s5609_s2 + $0xd8] sm:$0xff] }
  0xb2   :  { %3031 = vmatprep.mubr.msk.f32.mxu0 %vm136_vm0, %v127_v54 }
  0xb5   :  { %489 = vmatmul.mubr.f32.gmra.mrb[68].mxu0 %v126_v55  ;;  %v3431_v55 = vpack.c.bf16 %v3062_v50, %v3060_v49 }
  0xb6   :  { %3032 = vmatprep.mubr.msk.f32.mxu0 %vm136_vm0, %v129_v56 }
  0xb9   :  { %494 = vmatmul.mubr.f32.gmra.mrb[70].mxu0 %v128_v57 }
  0xba   :  { %3033 = vmatprep.mubr.msk.f32.mxu0 %vm136_vm0, %v131_v58  ;;  %v3434_v58 = vpack.c.bf16 %v3073_v53, %v3071_v52 }
  0xbd   :  { %499 = vmatmul.mubr.f32.gmra.mrb[72].mxu0 %v130_v59 }
  0xbe   :  { %3034 = vmatprep.mubr.msk.f32.mxu0 %vm136_vm0, %v133_v60 }
  0xc1   :  { %504 = vmatmul.mubr.f32.gmra.mrb[74].mxu0 %v132_v61 }
  0xc2   :  { %3035 = vmatprep.mubr.msk.f32.mxu0 %vm136_vm0, %v135_v62  ;;  %vm2972_vm0 = vcmask 1047558  }
  0xc5   :  { %509 = vmatmul.mubr.f32.gmra.mrb[76].mxu0 %v134_v63 }
  0xc6   :  { %2170 = vmatprep.mubr.f32.mxu0 %v3852_v4 }
 0x100   :  { %v4288_v0 = vpop.f32.mrb[0].mxu0 }
 0x101   :  { %v322_v1 = vpop.f32.mrb[1].mxu0 }
 0x104   :  { %v4290_v2 = vpop.f32.mrb[2].mxu0 }
 0x105   :  { %v327_v3 = vpop.f32.mrb[3].mxu0 }
 0x108   :  { %v4292_v5 = vpop.f32.mrb[4].mxu0 }
 0x109   :  { %v332_v6 = vpop.f32.mrb[5].mxu0 }
 0x10a   :  { %v3070_v6 = vld [vmem:[%s5609_s2 + $0xc0] sm:$0xff] }
 0x10c   :  { %v4294_v7 = vpop.f32.mrb[6].mxu0 }
 0x10d   :  { %v337_v8 = vpop.f32.mrb[7].mxu0  ;;  %v536_v14 = vrot.slane %v4294_v7, 2 }
 0x10e   :  { %v3072_v8 = vld [vmem:[%s5609_s2 + $0xd0] sm:$0xff] }
 0x10f   :  { %v3436_v12 = vpack.c.bf16 %v3072_v8, %v3070_v6  ;;  %v3113_v8 = vld [vmem:[%s5609_s2 + $0x188] sm:$0xff] }
 0x110   :  { %v340_v13 = vpop.f32.mrb[8].mxu0 }
 0x111   :  { %v537_v15 = vrot.slane %v340_v13, 2  ;;  %v342_v16 = vpop.f32.mrb[9].mxu0 }
 0x112   :  { %v3074_v16 = vld [vmem:[%s5609_s2 + $0xe0] sm:$0xff] }
 0x113   :  { %v538_v21 = vsel %vm535_vm4, %v536_v14, %v537_v15 }
 0x114   :  { %v345_v24 = vpop.f32.mrb[10].mxu0  ;;  %3046 = vmatmul.mubr.msk.f32.vlgmr.msra.gmra.mrb[0].mxu1 %vm543_vm5, %v538_v21 }
 0x115   :  { %v539_v25 = vrot.slane %v345_v24, 2  ;;  %v347_v26 = vpop.f32.mrb[11].mxu0  ;;  %629 = vmatprep.mubr.f32.mxu1 %v3852_v4  ;;  %3417 = vmatpush1.bf16.msra.mxu1 %v3416_v17  ;;  %v3076_v17 = vld [vmem:[%s5609_s2 + $0xf0] sm:$0xf] }
 0x116   :  { %3420 = vmatprep.subr.msk.bf16.mxu1 %vm4185_vm3, %v3418_v18  ;;  %v3085_v18 = vld [vmem:[%s5609_s2 + $0x108] sm:$0xff]  ;;  %v3441_v21 = vpack.c.bf16 %v3076_v17, %v3074_v16 }
 0x117   :  { %v540_v29 = vsel %vm535_vm4, %v537_v15, %v539_v25  ;;  %v3444_v23 = vpack.c.bf16 %v3087_v19, %v3085_v18 }
 0x118   :  { %v350_v30 = vpop.f32.mrb[12].mxu0  ;;  %3047 = vmatmul.mubr.msk.f32.gmra.mrb[2].mxu1 %vm543_vm5, %v540_v29  ;;  %v3086_v29 = vld [vmem:[%s5609_s2 + $0x110] sm:$0xff] }
 0x119   :  { %v541_v31 = vrot.slane %v350_v30, 2  ;;  %v352_v32 = vpop.f32.mrb[13].mxu0  ;;  %635 = vmatprep.mubr.f32.mxu1 %v3852_v4  ;;  %3423 = vmatpush1.bf16.msk.msra.mxu1 %vm4185_vm3, %v3421_v27  ;;  %v766_v36 = vrot.slane %v350_v30, 4  ;;  %v3089_v30 = vld [vmem:[%s5609_s2 + $0x128] sm:$0xff] }
 0x11a   :  { %3425 = vmatprep.subr.bf16.mxu1 %v3424_v28  ;;  %v3084_v28 = vld [vmem:[%s5609_s2 + $0x100] sm:$0xff] }
 0x11b   :  { %v542_v33 = vsel %vm535_vm4, %v539_v25, %v541_v31 }
 0x11c   :  { %v355_v35 = vpop.f32.mrb[14].mxu0  ;;  %3048 = vmatmul.mubr.msk.f32.gmra.mrb[4].mxu1 %vm543_vm5, %v542_v33  ;;  %v3446_v33 = vpack.c.bf16 %v3086_v29, %v3084_v28 }
 0x11d   :  { %v767_v37 = vrot.slane %v355_v35, 4  ;;  %641 = vmatprep.mubr.f32.mxu1 %v3852_v4  ;;  %v357_v38 = vpop.f32.mrb[15].mxu0 }
 0x11e   :  { %v3090_v38 = vld [vmem:[%s5609_s2 + $0x130] sm:$0xf] }
 0x11f   :  { %v768_v41 = vsel %vm552_vm1, %v766_v36, %v767_v37 }
 0x120   :  { %3049 = vmatmul.mubr.msk.f32.gmra.mrb[6].mxu1 %vm543_vm5, %v541_v31  ;;  %v360_v44 = vpop.f32.mrb[16].mxu0  ;;  %v3091_v31 = vld [vmem:[%s5609_s2 + $0x138] sm:$0xf] }
 0x121   :  { %729 = vmatprep.mubr.f32.mxu1 %v3852_v4  ;;  %v769_v46 = vrot.slane %v360_v44, 4  ;;  %v362_v47 = vpop.f32.mrb[17].mxu0  ;;  %v3448_v36 = vpack.c.bf16 %v3091_v31, %v3089_v30 }
 0x123   :  { %v770_v51 = vsel %vm552_vm1, %v767_v37, %v769_v46  ;;  %v3088_v37 = vld [vmem:[%s5609_s2 + $0x120] sm:$0xff] }
 0x124   :  { %3052 = vmatmul.mubr.msk.f32.vlgmr.msra.gmra.mrb[0].mxu1 %vm543_vm5, %v4288_v0  ;;  %v4364_v54 = vpop.f32.mrb[18].mxu0  ;;  %v3451_v43 = vpack.c.bf16 %v3090_v38, %v3088_v37 }
 0x125   :  { %735 = vmatprep.mubr.f32.mxu1 %v3852_v4  ;;  %3427 = vmatpush1.bf16.msra.mxu1 %v3426_v45  ;;  %v771_v56 = vrot.slane %v4364_v54, 4  ;;  %v367_v57 = vpop.f32.mrb[19].mxu0  ;;  %v897_v59 = vrot.slane %v4364_v54, 6 }
 0x126   :  { %3430 = vmatprep.subr.msk.bf16.mxu1 %vm4185_vm3, %v3428_v48  ;;  %v3103_v57 = vld [vmem:[%s5609_s2 + $0x168] sm:$0xff] }
 0x127   :  { %v772_v60 = vsel %vm552_vm1, %v769_v46, %v771_v56 }
 0x128   :  { %3053 = vmatmul.mubr.msk.f32.gmra.mrb[2].mxu1 %vm543_vm5, %v4290_v2  ;;  %v370_v61 = vpop.f32.mrb[20].mxu0 }
 0x129   :  { %741 = vmatprep.mubr.f32.mxu1 %v3852_v4  ;;  %3433 = vmatpush1.bf16.msk.msra.mxu1 %vm4185_vm3, %v3431_v55  ;;  %v898_v62 = vrot.slane %v370_v61, 6  ;;  %v372_v63 = vpop.f32.mrb[21].mxu0  ;;  %v3098_v55 = vld [vmem:[%s5609_s2 + $0x140] sm:$0xff] }
 0x12a   :  { %3435 = vmatprep.subr.bf16.mxu1 %v3434_v58  ;;  %v3105_v58 = vld [vmem:[%s5609_s2 + $0x178] sm:$0xf] }
 0x12b   :  { %v899_v0 = vsel %vm896_vm6, %v897_v59, %v898_v62 }
 0x12c   :  { %3054 = vmatmul.mubr.msk.f32.gmra.mrb[4].mxu1 %vm543_vm5, %v4292_v5  ;;  %v375_v1 = vpop.f32.mrb[22].mxu0  ;;  %v3077_v5 = vld [vmem:[%s5609_s2 + $0xf8] sm:$0xf] }
 0x12d   :  { %747 = vmatprep.mubr.f32.mxu1 %v3852_v4  ;;  %v900_v3 = vrot.slane %v375_v1, 6  ;;  %v377_v2 = vpop.f32.mrb[23].mxu0  ;;  %v3438_v15 = vpack.c.bf16 %v3077_v5, %v3075_v9  ;;  %v3458_v1 = vpack.c.bf16 %v3105_v58, %v3103_v57  ;;  %v3115_v9 = vld [vmem:[%s5609_s2 + $0x198] sm:$0xff]  ;;  %v3130_v58 = vld [vmem:[%s5609_s2 + $0x1e0] sm:$0xff] }
 0x12e   :  { %v3104_v2 = vld [vmem:[%s5609_s2 + $0x170] sm:$0xf] }
 0x12f   :  { %v901_v10 = vsel %vm896_vm6, %v898_v62, %v900_v3 }
 0x130   :  { %3055 = vmatmul.mubr.msk.f32.gmra.mrb[6].mxu1 %vm543_vm5, %v4294_v7  ;;  %v4396_v11 = vpop.f32.mrb[24].mxu0 }
 0x131   :  { %851 = vmatprep.mubr.f32.mxu1 %v3852_v4  ;;  %v902_v13 = vrot.slane %v4396_v11, 6  ;;  %v382_v14 = vpop.f32.mrb[25].mxu0 }
 0x133   :  { %v903_v7 = vsel %vm896_vm6, %v900_v3, %v902_v13  ;;  %v3102_v3 = vld [vmem:[%s5609_s2 + $0x160] sm:$0xff] }
 0x134   :  { %3066 = vmatmul.mubr.msk.f32.vlgmr.msra.gmra.mrb[0].mxu1 %vm543_vm5, %v768_v41  ;;  %v4416_v20 = vpop.f32.mrb[26].mxu0  ;;  %v3101_v41 = vld [vmem:[%s5609_s2 + $0x158] sm:$0xff] }
 0x135   :  { %857 = vmatprep.mubr.f32.mxu1 %v3852_v4  ;;  %3437 = vmatpush1.bf16.msra.mxu1 %v3436_v12  ;;  %v387_v22 = vpop.f32.mrb[27].mxu0  ;;  %v3454_v46 = vpack.c.bf16 %v3101_v41, %v3099_v40 }
 0x136   :  { %3440 = vmatprep.subr.msk.bf16.mxu1 %vm4185_vm3, %v3438_v15  ;;  %v3112_v22 = vld [vmem:[%s5609_s2 + $0x180] sm:$0xff] }
 0x138   :  { %3067 = vmatmul.mubr.msk.f32.gmra.mrb[2].mxu1 %vm543_vm5, %v770_v51  ;;  %v4422_v24 = vpop.f32.mrb[28].mxu0 }
 0x139   :  { %863 = vmatprep.mubr.f32.mxu1 %v3852_v4  ;;  %3443 = vmatpush1.bf16.msk.msra.mxu1 %vm4185_vm3, %v3441_v21  ;;  %v392_v25 = vpop.f32.mrb[29].mxu0 }
 0x13a   :  { %3445 = vmatprep.subr.bf16.mxu1 %v3444_v23  ;;  %v3114_v23 = vld [vmem:[%s5609_s2 + $0x190] sm:$0xff]  ;;  %v3119_v25 = vld [vmem:[%s5609_s2 + $0x1b8] sm:$0xf] }
 0x13b   :  { %v3466_v28 = vpack.c.bf16 %v3114_v23, %v3112_v22  ;;  %v3146_v22 = vld [vmem:[%s5609_s2 + $0x230] sm:$0xf] }
 0x13c   :  { %3068 = vmatmul.mubr.msk.f32.gmra.mrb[4].mxu1 %vm543_vm5, %v772_v60  ;;  %v4428_v26 = vpop.f32.mrb[30].mxu0 }
 0x13d   :  { %869 = vmatprep.mubr.f32.mxu1 %v3852_v4  ;;  %v397_v27 = vpop.f32.mrb[31].mxu0 }
 0x140   :  { %3069 = vmatmul.mubr.msk.f32.gmra.mrb[6].mxu1 %vm543_vm5, %v771_v56  ;;  %v4444_v32 = vpop.f32.mrb[32].mxu0  ;;  %v3100_v56 = vld [vmem:[%s5609_s2 + $0x150] sm:$0xff] }
 0x141   :  { %982 = vmatprep.mubr.f32.mxu1 %v3852_v4  ;;  %v402_v35 = vpop.f32.mrb[33].mxu0  ;;  %v1151_v39 = vrot.slane %v4444_v32, 2  ;;  %v3456_v62 = vpack.c.bf16 %v3100_v56, %v3098_v55 }
 0x142   :  { %v3118_v35 = vld [vmem:[%s5609_s2 + $0x1b0] sm:$0xf] }
 0x144   :  { %3080 = vmatmul.mubr.msk.f32.vlgmr.msra.gmra.mrb[0].mxu1 %vm543_vm5, %v899_v0  ;;  %v405_v42 = vpop.f32.mrb[34].mxu0 }
 0x145   :  { %988 = vmatprep.mubr.f32.mxu1 %v3852_v4  ;;  %3447 = vmatpush1.bf16.msra.mxu1 %v3446_v33  ;;  %v1152_v44 = vrot.slane %v405_v42, 2  ;;  %v407_v45 = vpop.f32.mrb[35].mxu0  ;;  %v3116_v33 = vld [vmem:[%s5609_s2 + $0x1a0] sm:$0xff] }
 0x146   :  { %3450 = vmatprep.subr.msk.bf16.mxu1 %vm4185_vm3, %v3448_v36  ;;  %v3127_v36 = vld [vmem:[%s5609_s2 + $0x1c8] sm:$0xff] }
 0x147   :  { %v4465_v47 = vsel %vm535_vm4, %v1151_v39, %v1152_v44  ;;  %v3471_v39 = vpack.c.bf16 %v3118_v35, %v3116_v33 }
 0x148   :  { %3081 = vmatmul.mubr.msk.f32.gmra.mrb[2].mxu1 %vm543_vm5, %v901_v10  ;;  %v410_v48 = vpop.f32.mrb[36].mxu0  ;;  %v3461_v10 = vpack.c.bf16 %v3104_v2, %v3102_v3 }
 0x149   :  { %994 = vmatprep.mubr.f32.mxu1 %v3852_v4  ;;  %3453 = vmatpush1.bf16.msk.msra.mxu1 %vm4185_vm3, %v3451_v43  ;;  %v1154_v49 = vrot.slane %v410_v48, 2  ;;  %v412_v50 = vpop.f32.mrb[37].mxu0  ;;  %v3126_v48 = vld [vmem:[%s5609_s2 + $0x1c0] sm:$0xff] }
 0x14a   :  { %3455 = vmatprep.subr.bf16.mxu1 %v3454_v46  ;;  %v3131_v50 = vld [vmem:[%s5609_s2 + $0x1e8] sm:$0xff] }
 0x14b   :  { %v4472_v51 = vsel %vm535_vm4, %v1152_v44, %v1154_v49 }
 0x14c   :  { %3082 = vmatmul.mubr.msk.f32.gmra.mrb[4].mxu1 %vm543_vm5, %v903_v7  ;;  %v4475_v52 = vpop.f32.mrb[38].mxu0 }
 0x14d   :  { %1000 = vmatprep.mubr.f32.mxu1 %v3852_v4  ;;  %v1156_v53 = vrot.slane %v4475_v52, 2  ;;  %v417_v54 = vpop.f32.mrb[39].mxu0  ;;  %v1281_v59 = vrot.slane %v4475_v52, 4  ;;  %v3141_v52 = vld [vmem:[%s5609_s2 + $0x208] sm:$0xff] }
 0x14f   :  { %v4495_v60 = vsel %vm535_vm4, %v1154_v49, %v1156_v53  ;;  %v3128_v49 = vld [vmem:[%s5609_s2 + $0x1d0] sm:$0xff] }
 0x150   :  { %3083 = vmatmul.mubr.msk.f32.gmra.mrb[6].mxu1 %vm543_vm5, %v902_v13  ;;  %v420_v61 = vpop.f32.mrb[40].mxu0  ;;  %v3464_v13 = vpack.c.bf16 %v3115_v9, %v3113_v8  ;;  %v3476_v55 = vpack.c.bf16 %v3128_v49, %v3126_v48 }
 0x151   :  { %1106 = vmatprep.mubr.f32.mxu1 %v3852_v4  ;;  %v1282_v63 = vrot.slane %v420_v61, 4  ;;  %v422_v0 = vpop.f32.mrb[41].mxu0 }
 0x153   :  { %v4508_v6 = vsel %vm552_vm1, %v1281_v59, %v1282_v63  ;;  %v3132_v59 = vld [vmem:[%s5609_s2 + $0x1f0] sm:$0xf] }
 0x154   :  { %3094 = vmatmul.mubr.msk.f32.vlgmr.msra.gmra.mrb[0].mxu1 %vm543_vm5, %v4416_v20  ;;  %v425_v5 = vpop.f32.mrb[42].mxu0  ;;  %v3481_v61 = vpack.c.bf16 %v3132_v59, %v3130_v58  ;;  %v3160_v58 = vld [vmem:[%s5609_s2 + $0x270] sm:$0xf] }
 0x155   :  { %1112 = vmatprep.mubr.f32.mxu1 %v3852_v4  ;;  %3457 = vmatpush1.bf16.msra.mxu1 %v3456_v62  ;;  %v1284_v11 = vrot.slane %v425_v5, 4  ;;  %v427_v12 = vpop.f32.mrb[43].mxu0 }
 0x156   :  { %3460 = vmatprep.subr.msk.bf16.mxu1 %vm4185_vm3, %v3458_v1  ;;  %v3145_v12 = vld [vmem:[%s5609_s2 + $0x228] sm:$0xff] }
 0x157   :  { %v4522_v14 = vsel %vm552_vm1, %v1282_v63, %v1284_v11 }
 0x158   :  { %3095 = vmatmul.mubr.msk.f32.gmra.mrb[2].mxu1 %vm543_vm5, %v4422_v24  ;;  %v4526_v15 = vpop.f32.mrb[44].mxu0  ;;  %v3117_v24 = vld [vmem:[%s5609_s2 + $0x1a8] sm:$0xff] }
 0x159   :  { %1118 = vmatprep.mubr.f32.mxu1 %v3852_v4  ;;  %3463 = vmatpush1.bf16.msk.msra.mxu1 %vm4185_vm3, %v3461_v10  ;;  %v1286_v16 = vrot.slane %v4526_v15, 4  ;;  %v432_v17 = vpop.f32.mrb[45].mxu0  ;;  %v1411_v7 = vrot.slane %v4526_v15, 6  ;;  %v3468_v31 = vpack.c.bf16 %v3119_v25, %v3117_v24  ;;  %v3140_v10 = vld [vmem:[%s5609_s2 + $0x200] sm:$0xff]  ;;  %v3155_v15 = vld [vmem:[%s5609_s2 + $0x248] sm:$0xff] }
 0x15a   :  { %3465 = vmatprep.subr.bf16.mxu1 %v3464_v13  ;;  %v3147_v13 = vld [vmem:[%s5609_s2 + $0x238] sm:$0xf] }
 0x15b   :  { %v4536_v18 = vsel %vm552_vm1, %v1284_v11, %v1286_v16  ;;  %v3142_v11 = vld [vmem:[%s5609_s2 + $0x210] sm:$0xff] }
 0x15c   :  { %3096 = vmatmul.mubr.msk.f32.gmra.mrb[4].mxu1 %vm543_vm5, %v4428_v26  ;;  %v435_v19 = vpop.f32.mrb[46].mxu0 }
 0x15d   :  { %1124 = vmatprep.mubr.f32.mxu1 %v3852_v4  ;;  %v1412_v20 = vrot.slane %v435_v19, 6  ;;  %v437_v21 = vpop.f32.mrb[47].mxu0 }
 0x15e   :  { %v3144_v21 = vld [vmem:[%s5609_s2 + $0x220] sm:$0xff] }
 0x15f   :  { %v4554_v26 = vsel %vm896_vm6, %v1411_v7, %v1412_v20  ;;  %v3486_v7 = vpack.c.bf16 %v3142_v11, %v3140_v10  ;;  %v3172_v11 = vld [vmem:[%s5609_s2 + $0x2a0] sm:$0xff] }
 0x160   :  { %3097 = vmatmul.mubr.msk.f32.gmra.mrb[6].mxu1 %vm543_vm5, %v4444_v32  ;;  %v440_v27 = vpop.f32.mrb[48].mxu0  ;;  %v3129_v32 = vld [vmem:[%s5609_s2 + $0x1d8] sm:$0xff] }
 0x161   :  { %1236 = vmatprep.mubr.f32.mxu1 %v3852_v4  ;;  %v1414_v29 = vrot.slane %v440_v27, 6  ;;  %v442_v30 = vpop.f32.mrb[49].mxu0  ;;  %v3474_v42 = vpack.c.bf16 %v3129_v32, %v3127_v36  ;;  %v3491_v27 = vpack.c.bf16 %v3146_v22, %v3144_v21  ;;  %v3189_v21 = vld [vmem:[%s5609_s2 + $0x2f8] sm:$0xf] }
 0x163   :  { %v4572_v37 = vsel %vm896_vm6, %v1412_v20, %v1414_v29  ;;  %v3488_v20 = vpack.c.bf16 %v3147_v13, %v3145_v12  ;;  %v3174_v12 = vld [vmem:[%s5609_s2 + $0x2b0] sm:$0xf]  ;;  %v3183_v13 = vld [vmem:[%s5609_s2 + $0x2c8] sm:$0xff] }
 0x164   :  { %3108 = vmatmul.mubr.msk.f32.vlgmr.msra.gmra.mrb[0].mxu1 %vm543_vm5, %v4465_v47  ;;  %v4576_v38 = vpop.f32.mrb[50].mxu0 }
 0x165   :  { %1242 = vmatprep.mubr.f32.mxu1 %v3852_v4  ;;  %3467 = vmatpush1.bf16.msra.mxu1 %v3466_v28  ;;  %v1416_v40 = vrot.slane %v4576_v38, 6  ;;  %v447_v41 = vpop.f32.mrb[51].mxu0  ;;  %v3169_v38 = vld [vmem:[%s5609_s2 + $0x288] sm:$0xff] }
 0x166   :  { %3470 = vmatprep.subr.msk.bf16.mxu1 %vm4185_vm3, %v3468_v31  ;;  %v3154_v41 = vld [vmem:[%s5609_s2 + $0x240] sm:$0xff] }
 0x167   :  { %v4585_v43 = vsel %vm896_vm6, %v1414_v29, %v1416_v40 }
 0x168   :  { %3109 = vmatmul.mubr.msk.f32.gmra.mrb[2].mxu1 %vm543_vm5, %v4472_v51  ;;  %v4589_v44 = vpop.f32.mrb[52].mxu0  ;;  %v3133_v51 = vld [vmem:[%s5609_s2 + $0x1f8] sm:$0xf] }
 0x169   :  { %1248 = vmatprep.mubr.f32.mxu1 %v3852_v4  ;;  %3473 = vmatpush1.bf16.msk.msra.mxu1 %vm4185_vm3, %v3471_v39  ;;  %v452_v45 = vpop.f32.mrb[53].mxu0  ;;  %v3478_v57 = vpack.c.bf16 %v3133_v51, %v3131_v50 }
 0x16a   :  { %3475 = vmatprep.subr.bf16.mxu1 %v3474_v42  ;;  %v3156_v42 = vld [vmem:[%s5609_s2 + $0x250] sm:$0xff]  ;;  %v3159_v45 = vld [vmem:[%s5609_s2 + $0x268] sm:$0xff] }
 0x16b   :  { %v3496_v50 = vpack.c.bf16 %v3156_v42, %v3154_v41  ;;  %v3269_v41 = vld [vmem:[%s5610_s5 + $0x390] sm:$0xff]  ;;  %v3272_v42 = vld [vmem:[%s5610_s5 + $0x3a8] sm:$0xff] }
 0x16c   :  { %3110 = vmatmul.mubr.msk.f32.gmra.mrb[4].mxu1 %vm543_vm5, %v4495_v60  ;;  %v4596_v46 = vpop.f32.mrb[54].mxu0 }
 0x16d   :  { %1254 = vmatprep.mubr.f32.mxu1 %v3852_v4  ;;  %v457_v47 = vpop.f32.mrb[55].mxu0 }
 0x170   :  { %3111 = vmatmul.mubr.msk.f32.gmra.mrb[6].mxu1 %vm543_vm5, %v1156_v53  ;;  %v4614_v54 = vpop.f32.mrb[56].mxu0  ;;  %v3143_v53 = vld [vmem:[%s5609_s2 + $0x218] sm:$0xff] }
 0x171   :  { %1366 = vmatprep.mubr.f32.mxu1 %v3852_v4  ;;  %v462_v56 = vpop.f32.mrb[57].mxu0  ;;  %v3484_v63 = vpack.c.bf16 %v3143_v53, %v3141_v52 }
 0x174   :  { %3122 = vmatmul.mubr.msk.f32.vlgmr.msra.gmra.mrb[0].mxu1 %vm543_vm5, %v4508_v6  ;;  %v4631_v60 = vpop.f32.mrb[58].mxu0 }
 0x175   :  { %1372 = vmatprep.mubr.f32.mxu1 %v3852_v4  ;;  %3477 = vmatpush1.bf16.msra.mxu1 %v3476_v55  ;;  %v467_v62 = vpop.f32.mrb[59].mxu0  ;;  %v1665_v0 = vrot.slane %v4631_v60, 2 }
 0x176   :  { %3480 = vmatprep.subr.msk.bf16.mxu1 %vm4185_vm3, %v3478_v57  ;;  %v3158_v57 = vld [vmem:[%s5609_s2 + $0x260] sm:$0xff] }
 0x177   :  { %v3501_v53 = vpack.c.bf16 %v3160_v58, %v3158_v57  ;;  %v3275_v57 = vld [vmem:[%s5610_s5 + $0x3c0] sm:$0xff]  ;;  %v3277_v58 = vld [vmem:[%s5610_s5 + $0x3d0] sm:$0xff] }
 0x178   :  { %3123 = vmatmul.mubr.msk.f32.gmra.mrb[2].mxu1 %vm543_vm5, %v4522_v14  ;;  %v470_v1 = vpop.f32.mrb[60].mxu0 }
 0x179   :  { %1378 = vmatprep.mubr.f32.mxu1 %v3852_v4  ;;  %3483 = vmatpush1.bf16.msk.msra.mxu1 %vm4185_vm3, %v3481_v61  ;;  %v1666_v3 = vrot.slane %v470_v1, 2  ;;  %v472_v2 = vpop.f32.mrb[61].mxu0 }
 0x17a   :  { %3485 = vmatprep.subr.bf16.mxu1 %v3484_v63 }
 0x17b   :  { %v4643_v6 = vsel %vm535_vm4, %v1665_v0, %v1666_v3 }
 0x17c   :  { %3124 = vmatmul.mubr.msk.f32.gmra.mrb[4].mxu1 %vm543_vm5, %v4536_v18  ;;  %v475_v8 = vpop.f32.mrb[62].mxu0 }
 0x17d   :  { %1384 = vmatprep.mubr.f32.mxu1 %v3852_v4  ;;  %v1668_v9 = vrot.slane %v475_v8, 2  ;;  %v477_v5 = vpop.f32.mrb[63].mxu0  ;;  %v3170_v8 = vld [vmem:[%s5609_s2 + $0x290] sm:$0xff] }
 0x17e   :  { %v3175_v5 = vld [vmem:[%s5609_s2 + $0x2b8] sm:$0xf] }
 0x17f   :  { %v4661_v14 = vsel %vm535_vm4, %v1666_v3, %v1668_v9 }
 0x180   :  { %3125 = vmatmul.mubr.msk.f32.gmra.mrb[6].mxu1 %vm543_vm5, %v1286_v16  ;;  %v4666_v17 = vpop.f32.mrb[64].mxu0  ;;  %v3157_v16 = vld [vmem:[%s5609_s2 + $0x258] sm:$0xff] }
 0x181   :  { %1496 = vmatprep.mubr.f32.mxu1 %v3852_v4  ;;  %v1670_v18 = vrot.slane %v4666_v17, 2  ;;  %v482_v19 = vpop.f32.mrb[65].mxu0  ;;  %v1795_v23 = vrot.slane %v4666_v17, 4  ;;  %v3494_v30 = vpack.c.bf16 %v3157_v16, %v3155_v15  ;;  %v3186_v16 = vld [vmem:[%s5609_s2 + $0x2e0] sm:$0xff] }
 0x183   :  { %v4686_v24 = vsel %vm535_vm4, %v1668_v9, %v1670_v18  ;;  %v3173_v9 = vld [vmem:[%s5609_s2 + $0x2a8] sm:$0xff] }
 0x184   :  { %3136 = vmatmul.mubr.msk.f32.vlgmr.msra.gmra.mrb[0].mxu1 %vm543_vm5, %v4554_v26  ;;  %v485_v25 = vpop.f32.mrb[66].mxu0  ;;  %v3508_v10 = vpack.c.bf16 %v3175_v5, %v3173_v9  ;;  %v3287_v5 = vld [vmem:[%s5610_s5 + $0x420] sm:$0xff] }
 0x185   :  { %1502 = vmatprep.mubr.f32.mxu1 %v3852_v4  ;;  %3487 = vmatpush1.bf16.msra.mxu1 %v3486_v7  ;;  %v1796_v28 = vrot.slane %v485_v25, 4  ;;  %v487_v29 = vpop.f32.mrb[67].mxu0  ;;  %v3511_v7 = vpack.c.bf16 %v3174_v12, %v3172_v11  ;;  %v3259_v25 = vld [vmem:[%s5610_s5 + $0x340] sm:$0xff]  ;;  %v3294_v11 = vld [vmem:[%s5610_s5 + $0x458] sm:$0xff] }
 0x186   :  { %3490 = vmatprep.subr.msk.bf16.mxu1 %vm4185_vm3, %v3488_v20  ;;  %v3184_v20 = vld [vmem:[%s5609_s2 + $0x2d0] sm:$0xff]  ;;  %v3264_v29 = vld [vmem:[%s5610_s5 + $0x368] sm:$0xff] }
 0x187   :  { %v4694_v31 = vsel %vm552_vm1, %v1795_v23, %v1796_v28  ;;  %v3188_v23 = vld [vmem:[%s5609_s2 + $0x2f0] sm:$0xf] }
 0x188   :  { %3137 = vmatmul.mubr.msk.f32.gmra.mrb[2].mxu1 %vm543_vm5, %v4572_v37  ;;  %v490_v33 = vpop.f32.mrb[68].mxu0  ;;  %v3521_v17 = vpack.c.bf16 %v3188_v23, %v3186_v16  ;;  %v3302_v16 = vld [vmem:[%s5610_s5 + $0x498] sm:$0xff] }
 0x189   :  { %1508 = vmatprep.mubr.f32.mxu1 %v3852_v4  ;;  %3493 = vmatpush1.bf16.msk.msra.mxu1 %vm4185_vm3, %v3491_v27  ;;  %v1798_v26 = vrot.slane %v490_v33, 4  ;;  %v492_v35 = vpop.f32.mrb[69].mxu0  ;;  %v3261_v27 = vld [vmem:[%s5610_s5 + $0x350] sm:$0xff]  ;;  %v3263_v33 = vld [vmem:[%s5610_s5 + $0x360] sm:$0xff] }
 0x18a   :  { %3495 = vmatprep.subr.bf16.mxu1 %v3494_v30  ;;  %v3266_v30 = vld [vmem:[%s5610_s5 + $0x378] sm:$0xff] }
 0x18b   :  { %v4702_v36 = vsel %vm552_vm1, %v1796_v28, %v1798_v26  ;;  %v3640_v28 = vpack.c.bf16 %v3261_v27, %v3259_v25  ;;  %v2043_v25 = vld [vmem:[%s5611_s3] sm:$0x3] }
 0x18c   :  { %3138 = vmatmul.mubr.msk.f32.gmra.mrb[4].mxu1 %vm543_vm5, %v4585_v43  ;;  %v4706_v32 = vpop.f32.mrb[70].mxu0  ;;  %v3161_v43 = vld [vmem:[%s5609_s2 + $0x278] sm:$0xf] }
 0x18d   :  { %1514 = vmatprep.mubr.f32.mxu1 %v3852_v4  ;;  %v1800_v37 = vrot.slane %v4706_v32, 4  ;;  %v497_v39 = vpop.f32.mrb[71].mxu0  ;;  %v1925_v47 = vrot.slane %v4706_v32, 6  ;;  %v3498_v56 = vpack.c.bf16 %v3161_v43, %v3159_v45  ;;  %v3270_v32 = vld [vmem:[%s5610_s5 + $0x398] sm:$0xff] }
 0x18e   :  { %v3267_v39 = vld [vmem:[%s5610_s5 + $0x380] sm:$0xff]  ;;  %v3274_v43 = vld [vmem:[%s5610_s5 + $0x3b8] sm:$0xff] }
 0x18f   :  { %v4726_v48 = vsel %vm552_vm1, %v1798_v26, %v1800_v37  ;;  %v3265_v26 = vld [vmem:[%s5610_s5 + $0x370] sm:$0xff]  ;;  %v3648_v45 = vpack.c.bf16 %v3269_v41, %v3267_v39 }
 0x190   :  { %3139 = vmatmul.mubr.msk.f32.gmra.mrb[6].mxu1 %vm543_vm5, %v1416_v40  ;;  %v500_v49 = vpop.f32.mrb[72].mxu0  ;;  %v3171_v40 = vld [vmem:[%s5609_s2 + $0x298] sm:$0xff]  ;;  %v3644_v35 = vpack.c.bf16 %v3265_v26, %v3263_v33 }
 0x191   :  { %1620 = vmatprep.mubr.f32.mxu1 %v3852_v4  ;;  %v1926_v51 = vrot.slane %v500_v49, 6  ;;  %v502_v55 = vpop.f32.mrb[73].mxu0  ;;  %v3504_v63 = vpack.c.bf16 %v3171_v40, %v3169_v38  ;;  %v3273_v49 = vld [vmem:[%s5610_s5 + $0x3b0] sm:$0xff]  ;;  %v3280_v38 = vld [vmem:[%s5610_s5 + $0x3e8] sm:$0xff]  ;;  %v3282_v40 = vld [vmem:[%s5610_s5 + $0x3f8] sm:$0xff] }
 0x193   :  { %v4745_v59 = vsel %vm896_vm6, %v1925_v47, %v1926_v51  ;;  %v3650_v47 = vpack.c.bf16 %v3274_v43, %v3272_v42 }
 0x194   :  { %3150 = vmatmul.mubr.msk.f32.vlgmr.msra.gmra.mrb[0].mxu1 %vm543_vm5, %v4589_v44  ;;  %v505_v52 = vpop.f32.mrb[74].mxu0 }
 0x195   :  { %1626 = vmatprep.mubr.f32.mxu1 %v3852_v4  ;;  %3497 = vmatpush1.bf16.msra.mxu1 %v3496_v50  ;;  %v1928_v61 = vrot.slane %v505_v52, 6  ;;  %v507_v62 = vpop.f32.mrb[75].mxu0  ;;  %v3276_v50 = vld [vmem:[%s5610_s5 + $0x3c8] sm:$0xff]  ;;  %v3658_v52 = vpack.c.bf16 %v3282_v40, %v3280_v38 }
 0x196   :  { %3500 = vmatprep.subr.msk.bf16.mxu1 %vm4185_vm3, %v3498_v56  ;;  %v3284_v62 = vld [vmem:[%s5610_s5 + $0x408] sm:$0xff] }
 0x197   :  { %v1929_v0 = vsel %vm896_vm6, %v1926_v51, %v1928_v61  ;;  %v3278_v51 = vld [vmem:[%s5610_s5 + $0x3d8] sm:$0xff] }
 0x198   :  { %3151 = vmatmul.mubr.msk.f32.gmra.mrb[2].mxu1 %vm543_vm5, %v4596_v46  ;;  %v510_v1 = vpop.f32.mrb[76].mxu0  ;;  %v3168_v46 = vld [vmem:[%s5609_s2 + $0x280] sm:$0xff]  ;;  %v3654_v56 = vpack.c.bf16 %v3278_v51, %v3276_v50 }
 0x199   :  { %1632 = vmatprep.mubr.f32.mxu1 %v3852_v4  ;;  %3503 = vmatpush1.bf16.msk.msra.mxu1 %vm4185_vm3, %v3501_v53  ;;  %v1930_v44 = vrot.slane %v510_v1, 6  ;;  %v512_v3 = vpop.f32.mrb[77].mxu0  ;;  %v3279_v53 = vld [vmem:[%s5610_s5 + $0x3e0] sm:$0xff] }
 0x19a   :  { %3505 = vmatprep.subr.bf16.mxu1 %v3504_v63  ;;  %v3286_v63 = vld [vmem:[%s5610_s5 + $0x418] sm:$0xff]  ;;  %v3285_v3 = vld [vmem:[%s5610_s5 + $0x410] sm:$0xff] }
 0x19b   :  { %v1931_v2 = vsel %vm896_vm6, %v1928_v61, %v1930_v44  ;;  %v3281_v61 = vld [vmem:[%s5610_s5 + $0x3f0] sm:$0xff]  ;;  %v3662_v1 = vpack.c.bf16 %v3286_v63, %v3284_v62 }
 0x19c   :  { %3152 = vmatmul.mubr.msk.f32.gmra.mrb[4].mxu1 %vm543_vm5, %v4614_v54  ;;  %v3506_v54 = vpack.c.bf16 %v3170_v8, %v3168_v46  ;;  %v3290_v46 = vld [vmem:[%s5610_s5 + $0x438] sm:$0xff] }
 0x19d   :  { %1638 = vmatprep.mubr.f32.mxu1 %v3852_v4 }
 0x1a0   :  { %3153 = vmatmul.mubr.msk.f32.gmra.mrb[6].mxu1 %vm543_vm5, %v4631_v60  ;;  %v3185_v60 = vld [vmem:[%s5609_s2 + $0x2d8] sm:$0xff] }
 0x1a1   :  { %1750 = vmatprep.mubr.f32.mxu1 %v3852_v4  ;;  %v3514_v19 = vpack.c.bf16 %v3185_v60, %v3183_v13  ;;  %v3291_v60 = vld [vmem:[%s5610_s5 + $0x440] sm:$0xff] }
 0x1a4   :  { %3164 = vmatmul.mubr.msk.f32.vlgmr.msra.gmra.mrb[0].mxu1 %vm543_vm5, %v4643_v6  ;;  %v3182_v6 = vld [vmem:[%s5609_s2 + $0x2c0] sm:$0xff] }
 0x1a5   :  { %1756 = vmatprep.mubr.f32.mxu1 %v3852_v4  ;;  %3507 = vmatpush1.bf16.msra.mxu1 %v3506_v54  ;;  %v3516_v22 = vpack.c.bf16 %v3184_v20, %v3182_v6  ;;  %v3289_v54 = vld [vmem:[%s5610_s5 + $0x430] sm:$0xff]  ;;  %v3298_v6 = vld [vmem:[%s5610_s5 + $0x478] sm:$0xff] }
 0x1a6   :  { %3510 = vmatprep.subr.msk.bf16.mxu1 %vm4185_vm3, %v3508_v10  ;;  %v3292_v10 = vld [vmem:[%s5610_s5 + $0x448] sm:$0xff]  ;;  %v3668_v12 = vpack.c.bf16 %v3289_v54, %v3287_v5 }
 0x1a7   :  { %v3670_v13 = vpack.c.bf16 %v3294_v11, %v3292_v10  ;;  %v3203_v10 = vld [vmem:[%s5610_s5 + $0x1a0] sm:$0xff]  ;;  %v3205_v11 = vld [vmem:[%s5610_s5 + $0x1b0] sm:$0xff] }
 0x1a8   :  { %3165 = vmatmul.mubr.msk.f32.gmra.mrb[2].mxu1 %vm543_vm5, %v4661_v14  ;;  %v3187_v14 = vld [vmem:[%s5609_s2 + $0x2e8] sm:$0xff] }
 0x1a9   :  { %1762 = vmatprep.mubr.f32.mxu1 %v3852_v4  ;;  %3513 = vmatpush1.bf16.msk.msra.mxu1 %vm4185_vm3, %v3511_v7  ;;  %v3518_v15 = vpack.c.bf16 %v3189_v21, %v3187_v14  ;;  %v3293_v7 = vld [vmem:[%s5610_s5 + $0x450] sm:$0xff]  ;;  %v3295_v21 = vld [vmem:[%s5610_s5 + $0x460] sm:$0xff] }
 0x1aa   :  { %3515 = vmatprep.subr.bf16.mxu1 %v3514_v19  ;;  %v3296_v19 = vld [vmem:[%s5610_s5 + $0x468] sm:$0xff]  ;;  %v3672_v20 = vpack.c.bf16 %v3293_v7, %v3291_v60  ;;  %v2079_v60 = vld [vmem:[%s5612_s4] sm:$0xff]  ;;  %v3536_v7 = vpack.c.bf16 %v3205_v11, %v3203_v10  ;;  %v3241_v10 = vld [vmem:[%s5610_s5 + $0x2d0] sm:$0xff] }
 0x1ab   :  { %v3674_v14 = vpack.c.bf16 %v3298_v6, %v3296_v19  ;;  %v3207_v6 = vld [vmem:[%s5610_s5 + $0x1c0] sm:$0xff]  ;;  %v3244_v11 = vld [vmem:[%s5610_s5 + $0x2e8] sm:$0xff] }
 0x1ac   :  { %3166 = vmatmul.mubr.msk.f32.gmra.mrb[4].mxu1 %vm543_vm5, %v4686_v24 }
 0x1ad   :  { %1768 = vmatprep.mubr.f32.mxu1 %v3852_v4 }
 0x1b0   :  { %3167 = vmatmul.mubr.msk.f32.gmra.mrb[6].mxu1 %vm543_vm5, %v1670_v18  ;;  %v3262_v18 = vld [vmem:[%s5610_s5 + $0x358] sm:$0xff] }
 0x1b1   :  { %1880 = vmatprep.mubr.f32.mxu1 %v3852_v4  ;;  %v3638_v24 = vpack.c.bf16 %v3262_v18, %v3260_v34  ;;  %v2045_v34 = vlaneseq }
 0x1b3   :  { %v2046_v18 = vshrl.u32 %v2045_v34, 7  ;;  %v3216_v34 = vld [vmem:[%s5610_s5 + $0x208] sm:$0xff] }
 0x1b4   :  { %3178 = vmatmul.mubr.msk.f32.vlgmr.msra.gmra.mrb[0].mxu1 %vm543_vm5, %v4694_v31  ;;  %v3642_v31 = vpack.c.bf16 %v3266_v30, %v3264_v29 }
 0x1b5   :  { %1886 = vmatprep.mubr.f32.mxu1 %v3852_v4  ;;  %3517 = vmatpush1.bf16.msra.mxu1 %v3516_v22  ;;  %v3297_v22 = vld [vmem:[%s5610_s5 + $0x470] sm:$0xff]  ;;  %v4980_v27 = vsub.s32 1, %v2046_v18 }
 0x1b6   :  { %3520 = vmatprep.subr.msk.bf16.mxu1 %vm4185_vm3, %v3518_v15  ;;  %v3300_v15 = vld [vmem:[%s5610_s5 + $0x488] sm:$0xff]  ;;  %v3676_v23 = vpack.c.bf16 %v3297_v22, %v3295_v21  ;;  %v3214_v21 = vld [vmem:[%s5610_s5 + $0x1f8] sm:$0xff] }
 0x1b7   :  { %v2052_v29 = vrot.slane %v2043_v25, %v4980_v27  ;;  %v2080_v22 = vld [vmem:[%s5612_s4 + $0x8] sm:$0xff] }
 0x1b8   :  { %3179 = vmatmul.mubr.msk.f32.gmra.mrb[2].mxu1 %vm543_vm5, %v4702_v36  ;;  %v3268_v36 = vld [vmem:[%s5610_s5 + $0x388] sm:$0xff] }
 0x1b9   :  { %1892 = vmatprep.mubr.f32.mxu1 %v3852_v4  ;;  %3523 = vmatpush1.bf16.msk.msra.mxu1 %vm4185_vm3, %v3521_v17  ;;  %v3678_v17 = vpack.c.bf16 %v3302_v16, %v3300_v15 }
 0x1ba   :  { %3639 = vmatprep.subr.bf16.mxu1 %v3638_v24  ;;  %v4975_v24 = vsub.s32 0, %v2046_v18  ;;  %v3218_v18 = vld [vmem:[%s5610_s5 + $0x218] sm:$0xff] }
 0x1bc   :  { %3180 = vmatmul.mubr.msk.f32.gmra.mrb[4].mxu1 %vm543_vm5, %v4726_v48  ;;  %v3271_v48 = vld [vmem:[%s5610_s5 + $0x3a0] sm:$0xff] }
 0x1bd   :  { %1898 = vmatprep.mubr.f32.mxu1 %v3852_v4  ;;  %v3652_v55 = vpack.c.bf16 %v3273_v49, %v3271_v48 }
 0x1c0   :  { %3181 = vmatmul.mubr.msk.f32.gmra.mrb[6].mxu1 %vm543_vm5, %v1800_v37  ;;  %v3646_v37 = vpack.c.bf16 %v3270_v32, %v3268_v36 }
 0x1c1   :  { %2010 = vmatprep.mubr.f32.mxu1 %v3852_v4 }
 0x1c4   :  { %3192 = vmatmul.mubr.msk.f32.vlgmr.msra.gmra.mrb[0].mxu1 %vm543_vm5, %v4745_v59  ;;  %v3656_v59 = vpack.c.bf16 %v3277_v58, %v3275_v57 }
 0x1c5   :  { %2016 = vmatprep.mubr.f32.mxu1 %v3852_v4  ;;  %3641 = vmatpush1.bf16.msra.mxu1 %v3640_v28  ;;  %v2048_v28 = vrot.slane %v2043_v25, %v4975_v24  ;;  %v2081_v25 = vld [vmem:[%s5612_s4 + $0x10] sm:$0xff] }
 0x1c6   :  { %3643 = vmatprep.subr.bf16.mxu1 %v3642_v31 }
 0x1c8   :  { %3193 = vmatmul.mubr.msk.f32.gmra.mrb[2].mxu1 %vm543_vm5, %v1929_v0  ;;  %v3660_v0 = vpack.c.bf16 %v3281_v61, %v3279_v53 }
 0x1c9   :  { %2022 = vmatprep.mubr.f32.mxu1 %v3852_v4  ;;  %3645 = vmatpush1.bf16.msra.mxu1 %v3644_v35 }
 0x1ca   :  { %3647 = vmatprep.subr.bf16.mxu1 %v3646_v37 }
 0x1cc   :  { %3194 = vmatmul.mubr.msk.f32.gmra.mrb[4].mxu1 %vm543_vm5, %v1931_v2  ;;  %v3288_v2 = vld [vmem:[%s5610_s5 + $0x428] sm:$0xff] }
 0x1cd   :  { %2028 = vmatprep.mubr.f32.mxu1 %v3852_v4  ;;  %3649 = vmatpush1.bf16.msra.mxu1 %v3648_v45  ;;  %v3666_v9 = vpack.c.bf16 %v3290_v46, %v3288_v2 }
 0x1ce   :  { %3651 = vmatprep.subr.bf16.mxu1 %v3650_v47 }
 0x1d0   :  { %3195 = vmatmul.mubr.msk.f32.gmra.mrb[6].mxu1 %vm543_vm5, %v1930_v44  ;;  %v3283_v44 = vld [vmem:[%s5610_s5 + $0x400] sm:$0xff] }
 0x1d1   :  { %3653 = vmatpush1.bf16.msra.mxu1 %v3652_v55  ;;  %v3664_v8 = vpack.c.bf16 %v3285_v3, %v3283_v44  ;;  %v3204_v44 = vld [vmem:[%s5610_s5 + $0x1a8] sm:$0xff]  ;;  %v3206_v3 = vld [vmem:[%s5610_s5 + $0x1b8] sm:$0xff] }
 0x1d2   :  { %3655 = vmatprep.subr.bf16.mxu1 %v3654_v56  ;;  %v3534_v54 = vpack.c.bf16 %v3206_v3, %v3204_v44  ;;  %v3235_v44 = vld [vmem:[%s5610_s5 + $0x2a0] sm:$0xff]  ;;  %v3237_v3 = vld [vmem:[%s5610_s5 + $0x2b0] sm:$0xff] }
 0x1d5   :  { %3657 = vmatpush1.bf16.msra.mxu1 %v3656_v59 }
 0x1d6   :  { %3659 = vmatprep.subr.bf16.mxu1 %v3658_v52 }
 0x1d9   :  { %3661 = vmatpush1.bf16.msra.mxu1 %v3660_v0 }
 0x1da   :  { %3663 = vmatprep.subr.bf16.mxu1 %v3662_v1 }
 0x1dd   :  { %3665 = vmatpush1.bf16.msra.mxu1 %v3664_v8 }
 0x1de   :  { %3667 = vmatprep.subr.bf16.mxu1 %v3666_v9  ;;  %v3371_v9 = vld [vmem:[%s5615_s8 + $0x4] sm:$0x3] }
 0x1e1   :  { %3669 = vmatpush1.bf16.msra.mxu1 %v3668_v12  ;;  %v3208_v12 = vld [vmem:[%s5610_s5 + $0x1c8] sm:$0xff] }
 0x1e2   :  { %3671 = vmatprep.subr.bf16.mxu1 %v3670_v13  ;;  %v3210_v13 = vld [vmem:[%s5610_s5 + $0x1d8] sm:$0xff] }
 0x1e3   :  { %v3538_v19 = vpack.c.bf16 %v3210_v13, %v3208_v12  ;;  %v3246_v12 = vld [vmem:[%s5610_s5 + $0x2f8] sm:$0xff] }
 0x1e5   :  { %3673 = vmatpush1.bf16.msra.mxu1 %v3672_v20  ;;  %v3209_v20 = vld [vmem:[%s5610_s5 + $0x1d0] sm:$0xff] }
 0x1e6   :  { %3675 = vmatprep.subr.bf16.mxu1 %v3674_v14  ;;  %v3212_v14 = vld [vmem:[%s5610_s5 + $0x1e8] sm:$0xff]  ;;  %v3540_v15 = vpack.c.bf16 %v3209_v20, %v3207_v6  ;;  %v3299_v20 = vld [vmem:[%s5610_s5 + $0x480] sm:$0xff] }
 0x1e7   :  { %v3542_v16 = vpack.c.bf16 %v3214_v21, %v3212_v14  ;;  %v3301_v14 = vld [vmem:[%s5610_s5 + $0x490] sm:$0xff] }
 0x1e8   :  { %v3680_v21 = vpack.c.bf16 %v3301_v14, %v3299_v20  ;;  %v3320_v20 = vld [vmem:[%s5610_s5 + $0x518] sm:$0xff]  ;;  %v2210_v14 = vld [vmem:[%s5610_s5 + $0x48] sm:$0xff] }
 0x1e9   :  { %3677 = vmatpush1.bf16.msra.mxu1 %v3676_v23  ;;  %v3211_v23 = vld [vmem:[%s5610_s5 + $0x1e0] sm:$0xff] }
 0x1ea   :  { %3679 = vmatprep.subr.bf16.mxu1 %v3678_v17  ;;  %v3213_v17 = vld [vmem:[%s5610_s5 + $0x1f0] sm:$0xff] }
 0x1ed   :  { %3681 = vmatpush1.bf16.msra.mxu1 %v3680_v21  ;;  %v2212_v21 = vld [vmem:[%s5610_s5 + $0x58] sm:$0xff] }
 0x297   :  { %v2012_v30 = vpop.f32.mrb[0].mxu1 }
 0x298   :  { %v2055_v31 = vadd.f32 %v2048_v28, %v2012_v30  ;;  %v2014_v33 = vpop.f32.mrb[1].mxu1  ;;  %v3215_v30 = vld [vmem:[%s5610_s5 + $0x200] sm:$0xff] }
 0x299   :  { %v2056_v26 = vadd.f32 %v2052_v29, %v2014_v33  ;;  %v3220_v33 = vld [vmem:[%s5610_s5 + $0x228] sm:$0xff] }
 0x29a   :  { %v2063_v36 = vmul.f32 0.2, %v2055_v31 }
 0x29b   :  { %v2018_v35 = vpop.f32.mrb[2].mxu1  ;;  %v2064_v39 = vmul.f32 0.2, %v2056_v26 }
 0x29c   :  { %v2057_v32 = vadd.f32 %v2048_v28, %v2018_v35  ;;  %v2020_v37 = vpop.f32.mrb[3].mxu1  ;;  %v2071_v47 = vmax.f32 %v2055_v31, %v2063_v36  ;;  %v3217_v31 = vld [vmem:[%s5610_s5 + $0x210] sm:$0xff]  ;;  %v2082_v35 = vld [vmem:[%s5612_s4 + $0x18] sm:$0xff] }
 0x29d   :  { %v2058_v41 = vadd.f32 %v2052_v29, %v2020_v37  ;;  %v2072_v51 = vmax.f32 %v2056_v26, %v2064_v39  ;;  %v3222_v26 = vld [vmem:[%s5610_s5 + $0x238] sm:$0xff]  ;;  %v3548_v36 = vpack.c.bf16 %v3217_v31, %v3215_v30  ;;  %v3219_v37 = vld [vmem:[%s5610_s5 + $0x220] sm:$0xff]  ;;  %v3221_v39 = vld [vmem:[%s5610_s5 + $0x230] sm:$0xff] }
 0x29e   :  { %v2065_v42 = vmul.f32 0.2, %v2057_v32  ;;  %v3303_v30 = vld [vmem:[%s5610_s5 + $0x4a0] sm:$0xff]  ;;  %v3305_v31 = vld [vmem:[%s5610_s5 + $0x4b0] sm:$0xff] }
 0x29f   :  { %v2066_v45 = vmul.f32 0.2, %v2058_v41  ;;  %v2024_v43 = vpop.f32.mrb[4].mxu1 }
 0x2a0   :  { %v2073_v48 = vmax.f32 %v2057_v32, %v2065_v42  ;;  %v2059_v49 = vadd.f32 %v2048_v28, %v2024_v43  ;;  %v2026_v50 = vpop.f32.mrb[5].mxu1  ;;  %v3550_v32 = vpack.c.bf16 %v3222_v26, %v3220_v33  ;;  %v3226_v42 = vld [vmem:[%s5610_s5 + $0x258] sm:$0xff]  ;;  %v3552_v43 = vpack.c.bf16 %v3221_v39, %v3219_v37  ;;  %v3308_v39 = vld [vmem:[%s5610_s5 + $0x4c8] sm:$0xff] }
 0x2a1   :  { %v2074_v55 = vmax.f32 %v2058_v41, %v2066_v45  ;;  %v2060_v56 = vadd.f32 %v2052_v29, %v2026_v50  ;;  %v3224_v41 = vld [vmem:[%s5610_s5 + $0x248] sm:$0xff]  ;;  %v2083_v45 = vld [vmem:[%s5612_s4 + $0x20] sm:$0xff]  ;;  %v3254_v33 = vld [vmem:[%s5610_s5 + $0x338] sm:$0xff]  ;;  %v3684_v26 = vpack.c.bf16 %v3305_v31, %v3303_v30 }
 0x2a2   :  { %v3526_v57 = vpack.c.bf16 %v2073_v48, %v2071_v47  ;;  %v2067_v40 = vmul.f32 0.2, %v2059_v49  ;;  %v3554_v47 = vpack.c.bf16 %v3226_v42, %v3224_v41  ;;  %v3223_v48 = vld [vmem:[%s5610_s5 + $0x240] sm:$0xff]  ;;  %v3228_v50 = vld [vmem:[%s5610_s5 + $0x268] sm:$0xff]  ;;  %v3310_v41 = vld [vmem:[%s5610_s5 + $0x4d8] sm:$0xff] }
 0x2a3   :  { %v2030_v58 = vpop.f32.mrb[6].mxu1  ;;  %v3524_v38 = vpack.c.bf16 %v2074_v55, %v2072_v51  ;;  %v2068_v53 = vmul.f32 0.2, %v2060_v56  ;;  %v3230_v51 = vld [vmem:[%s5610_s5 + $0x278] sm:$0xff]  ;;  %v2202_v42 = vld [vmem:[%s5610_s5 + $0x8] sm:$0xff]  ;;  %v2209_v31 = vld [vmem:[%s5610_s5 + $0x40] sm:$0xff] }
 0x2a4   :  { %v2061_v59 = vadd.f32 %v2048_v28, %v2030_v58  ;;  %v2032_v52 = vpop.f32.mrb[7].mxu1  ;;  %v2075_v0 = vmax.f32 %v2059_v49, %v2067_v40  ;;  %v3544_v28 = vpack.c.bf16 %v3213_v17, %v3211_v23  ;;  %v3225_v49 = vld [vmem:[%s5610_s5 + $0x250] sm:$0xff]  ;;  %v3234_v40 = vld [vmem:[%s5610_s5 + $0x298] sm:$0xff]  ;;  %v3247_v23 = vld [vmem:[%s5610_s5 + $0x300] sm:$0xff] }
 0x2a5   :  { %v2062_v61 = vadd.f32 %v2052_v29, %v2032_v52  ;;  %3525 = vmatprep.subr.bf16.mxu0 %v3524_v38  ;;  %v2076_v2 = vmax.f32 %v2060_v56, %v2068_v53  ;;  %v3546_v29 = vpack.c.bf16 %v3218_v18, %v3216_v34  ;;  %v3556_v55 = vpack.c.bf16 %v3225_v49, %v3223_v48  ;;  %v3229_v58 = vld [vmem:[%s5610_s5 + $0x270] sm:$0xff]  ;;  %v3232_v38 = vld [vmem:[%s5610_s5 + $0x288] sm:$0xff]  ;;  %v3231_v53 = vld [vmem:[%s5610_s5 + $0x280] sm:$0xff] }
 0x2a6   :  { %v2069_v62 = vmul.f32 0.2, %v2061_v59  ;;  %3527 = vmatpush1.bf16.msra.mxu0 %v3526_v57  ;;  %v3558_v56 = vpack.c.bf16 %v3230_v51, %v3228_v50  ;;  %v3227_v57 = vld [vmem:[%s5610_s5 + $0x260] sm:$0xff]  ;;  %v3562_v52 = vpack.c.bf16 %v3234_v40, %v3232_v38  ;;  %v3249_v17 = vld [vmem:[%s5610_s5 + $0x310] sm:$0xff]  ;;  %v3304_v18 = vld [vmem:[%s5610_s5 + $0x4a8] sm:$0xff] }
 0x2a7   :  { %v2070_v63 = vmul.f32 0.2, %v2062_v61  ;;  %v3580_v34 = vpack.c.bf16 %v3249_v17, %v3247_v23  ;;  %v2204_v48 = vld [vmem:[%s5610_s5 + $0x18] sm:$0xff]  ;;  %v3314_v51 = vld [vmem:[%s5610_s5 + $0x4e8] sm:$0xff] }
 0x2a8   :  { %v2077_v1 = vmax.f32 %v2061_v59, %v2069_v62  ;;  %v3560_v59 = vpack.c.bf16 %v3229_v58, %v3227_v57  ;;  %v3236_v62 = vld [vmem:[%s5610_s5 + $0x2a8] sm:$0xff]  ;;  %v3586_v50 = vpack.c.bf16 %v2204_v48, %v2202_v42  ;;  %v3321_v48 = vld [vmem:[%s5610_s5 + $0x520] sm:$0xff] }
 0x2a9   :  { %v2078_v46 = vmax.f32 %v2062_v61, %v2070_v63  ;;  %v3233_v61 = vld [vmem:[%s5610_s5 + $0x290] sm:$0xff]  ;;  %v3238_v63 = vld [vmem:[%s5610_s5 + $0x2b8] sm:$0xff]  ;;  %v3322_v30 = vld [vmem:[%s5610_s5 + $0x528] sm:$0xff] }
 0x2aa   :  { %v3531_v8 = vpack.c.bf16 %v2077_v1, %v2075_v0  ;;  %v3564_v0 = vpack.c.bf16 %v3233_v61, %v3231_v53  ;;  %v3566_v1 = vpack.c.bf16 %v3238_v63, %v3236_v62  ;;  %v2203_v53 = vld [vmem:[%s5610_s5 + $0x10] sm:$0xff] }
 0x2ab   :  { %v3528_v5 = vpack.c.bf16 %v2078_v46, %v2076_v2  ;;  %v3240_v2 = vld [vmem:[%s5610_s5 + $0x2c8] sm:$0xff]  ;;  %v3242_v46 = vld [vmem:[%s5610_s5 + $0x2d8] sm:$0xff] }
 0x2ad   :  { %3530 = vmatprep.subr.msk.bf16.mxu0 %vm4992_vm7, %v3528_v5  ;;  %v3570_v5 = vpack.c.bf16 %v3242_v46, %v3240_v2 }
 0x2ae   :  { %3533 = vmatpush1.bf16.msk.msra.mxu0 %vm4992_vm7, %v3531_v8  ;;  %v3568_v8 = vpack.c.bf16 %v3237_v3, %v3235_v44 }
 0x2af   :  { %3535 = vmatprep.subr.bf16.mxu0 %v3534_v54  ;;  %v3239_v54 = vld [vmem:[%s5610_s5 + $0x2c0] sm:$0xff] }
 0x2b0   :  { %v3572_v13 = vpack.c.bf16 %v3241_v10, %v3239_v54 }
 0x2b1   :  { %3198 = vmatmul.mubr.msk.f32.vlgmr.msra.gmra.mrb[78].mxu0 %vm2084_vm8, %v2079_v60  ;;  %v3574_v60 = vpack.c.bf16 %v3246_v12, %v3244_v11  ;;  %v3318_v12 = vld [vmem:[%s5610_s5 + $0x508] sm:$0xff] }
 0x2b2   :  { %2176 = vmatprep.mubr.f32.mxu0 %v3852_v4  ;;  %3537 = vmatpush1.bf16.msra.mxu0 %v3536_v7  ;;  %v3243_v7 = vld [vmem:[%s5610_s5 + $0x2e0] sm:$0xff] }
 0x2b3   :  { %3539 = vmatprep.subr.bf16.mxu0 %v3538_v19  ;;  %v3245_v19 = vld [vmem:[%s5610_s5 + $0x2f0] sm:$0xff] }
 0x2b4   :  { %v3576_v6 = vpack.c.bf16 %v3245_v19, %v3243_v7 }
 0x2b5   :  { %3199 = vmatmul.mubr.msk.f32.gmra.mrb[80].mxu0 %vm2084_vm8, %v2080_v22  ;;  %v3248_v22 = vld [vmem:[%s5610_s5 + $0x308] sm:$0xff] }
 0x2b6   :  { %2182 = vmatprep.mubr.f32.mxu0 %v3852_v4  ;;  %3541 = vmatpush1.bf16.msra.mxu0 %v3540_v15  ;;  %v3250_v15 = vld [vmem:[%s5610_s5 + $0x318] sm:$0xff] }
 0x2b7   :  { %3543 = vmatprep.subr.bf16.mxu0 %v3542_v16  ;;  %v3578_v16 = vpack.c.bf16 %v3250_v15, %v3248_v22 }
 0x2b9   :  { %3200 = vmatmul.mubr.msk.f32.gmra.mrb[82].mxu0 %vm2084_vm8, %v2081_v25  ;;  %v3306_v25 = vld [vmem:[%s5610_s5 + $0x4b8] sm:$0xff] }
 0x2ba   :  { %2188 = vmatprep.mubr.f32.mxu0 %v3852_v4  ;;  %3545 = vmatpush1.bf16.msra.mxu0 %v3544_v28  ;;  %v3252_v28 = vld [vmem:[%s5610_s5 + $0x328] sm:$0xff] }
 0x2bb   :  { %3547 = vmatprep.subr.bf16.mxu0 %v3546_v29  ;;  %v3682_v29 = vpack.c.bf16 %v3306_v25, %v3304_v18  ;;  %v3319_v18 = vld [vmem:[%s5610_s5 + $0x510] sm:$0xff] }
 0x2bd   :  { %3201 = vmatmul.mubr.msk.f32.gmra.mrb[84].mxu0 %vm2084_vm8, %v2082_v35  ;;  %v3582_v35 = vpack.c.bf16 %v3254_v33, %v3252_v28  ;;  %3683 = vmatprep.subr.bf16.mxu1 %v3682_v29  ;;  %v3694_v28 = vpack.c.bf16 %v3320_v20, %v3318_v12  ;;  %v3594_v29 = vpack.c.bf16 %v2212_v21, %v2210_v14  ;;  %v2211_v33 = vld [vmem:[%s5610_s5 + $0x50] sm:$0xff]  ;;  %v3334_v20 = vld [vmem:[%s5610_s5 + $0x588] sm:$0xff]  ;;  %v2221_v14 = vld [vmem:[%s5610_s5 + $0xa0] sm:$0xff] }
 0x2be   :  { %2194 = vmatprep.mubr.f32.mxu0 %v3852_v4  ;;  %3549 = vmatpush1.bf16.msra.mxu0 %v3548_v36  ;;  %v3251_v36 = vld [vmem:[%s5610_s5 + $0x320] sm:$0xff]  ;;  %v2223_v21 = vld [vmem:[%s5610_s5 + $0xb0] sm:$0xff] }
 0x2bf   :  { %3551 = vmatprep.subr.bf16.mxu0 %v3550_v32  ;;  %v3253_v32 = vld [vmem:[%s5610_s5 + $0x330] sm:$0xff]  ;;  %3685 = vmatpush1.bf16.msra.mxu1 %v3684_v26 }
 0x2c0   :  { %v3584_v37 = vpack.c.bf16 %v3253_v32, %v3251_v36  ;;  %v3324_v36 = vld [vmem:[%s5610_s5 + $0x538] sm:$0xff]  ;;  %v2214_v32 = vld [vmem:[%s5610_s5 + $0x68] sm:$0xff] }
 0x2c1   :  { %3202 = vmatmul.mubr.msk.f32.gmra.mrb[86].mxu0 %vm2084_vm8, %v2083_v45  ;;  %v3686_v45 = vpack.c.bf16 %v3310_v41, %v3308_v39 }
 0x2c2   :  { %3553 = vmatpush1.bf16.msra.mxu0 %v3552_v43  ;;  %v3307_v43 = vld [vmem:[%s5610_s5 + $0x4c0] sm:$0xff] }
 0x2c3   :  { %3555 = vmatprep.subr.bf16.mxu0 %v3554_v47  ;;  %v3309_v47 = vld [vmem:[%s5610_s5 + $0x4d0] sm:$0xff]  ;;  %3687 = vmatprep.subr.bf16.mxu1 %v3686_v45 }
 0x2c4   :  { %v3688_v49 = vpack.c.bf16 %v3309_v47, %v3307_v43  ;;  %v3596_v47 = vpack.c.bf16 %v2211_v33, %v2209_v31  ;;  %v2227_v31 = vld [vmem:[%s5610_s5 + $0xd0] sm:$0xff]  ;;  %v3340_v33 = vld [vmem:[%s5610_s5 + $0x5b8] sm:$0xff] }
 0x2c6   :  { %3557 = vmatpush1.bf16.msra.mxu0 %v3556_v55  ;;  %3689 = vmatpush1.bf16.msra.mxu1 %v3688_v49  ;;  %v3316_v55 = vld [vmem:[%s5610_s5 + $0x4f8] sm:$0xff]  ;;  %v3323_v49 = vld [vmem:[%s5610_s5 + $0x530] sm:$0xff] }
 0x2c7   :  { %3559 = vmatprep.subr.bf16.mxu0 %v3558_v56  ;;  %v3690_v56 = vpack.c.bf16 %v3316_v55, %v3314_v51  ;;  %v3698_v51 = vpack.c.bf16 %v3324_v36, %v3322_v30  ;;  %v2225_v30 = vld [vmem:[%s5610_s5 + $0xc0] sm:$0xff]  ;;  %v2232_v36 = vld [vmem:[%s5610_s5 + $0xf8] sm:$0xff] }
 0x2c9   :  { %3691 = vmatprep.subr.bf16.mxu1 %v3690_v56  ;;  %v3326_v56 = vld [vmem:[%s5610_s5 + $0x548] sm:$0xff] }
 0x2ca   :  { %3561 = vmatpush1.bf16.msra.mxu0 %v3560_v59 }
 0x2cb   :  { %3563 = vmatprep.subr.bf16.mxu0 %v3562_v52  ;;  %v2201_v52 = vld [vmem:[%s5610_s5] sm:$0xff] }
 0x2cc   :  { %v3588_v46 = vpack.c.bf16 %v2203_v53, %v2201_v52  ;;  %v2215_v52 = vld [vmem:[%s5610_s5 + $0x70] sm:$0xff] }
 0x2ce   :  { %3565 = vmatpush1.bf16.msra.mxu0 %v3564_v0  ;;  %v2206_v0 = vld [vmem:[%s5610_s5 + $0x28] sm:$0xff] }
 0x2cf   :  { %3567 = vmatprep.subr.bf16.mxu0 %v3566_v1  ;;  %v2208_v1 = vld [vmem:[%s5610_s5 + $0x38] sm:$0xff] }
 0x2d0   :  { %v3590_v11 = vpack.c.bf16 %v2208_v1, %v2206_v0  ;;  %v3700_v0 = vpack.c.bf16 %v3323_v49, %v3321_v48  ;;  %v3342_v49 = vld [vmem:[%s5610_s5 + $0x5c8] sm:$0xff] }
 0x2d2   :  { %3569 = vmatpush1.bf16.msra.mxu0 %v3568_v8  ;;  %v3313_v8 = vld [vmem:[%s5610_s5 + $0x4e0] sm:$0xff] }
 0x2d3   :  { %3571 = vmatprep.subr.bf16.mxu0 %v3570_v5  ;;  %v3315_v5 = vld [vmem:[%s5610_s5 + $0x4f0] sm:$0xff] }
 0x2d4   :  { %v3692_v23 = vpack.c.bf16 %v3315_v5, %v3313_v8  ;;  %v2217_v8 = vld [vmem:[%s5610_s5 + $0x80] sm:$0xff]  ;;  %v2219_v5 = vld [vmem:[%s5610_s5 + $0x90] sm:$0xff] }
 0x2d6   :  { %3573 = vmatpush1.bf16.msra.mxu0 %v3572_v13  ;;  %v2205_v13 = vld [vmem:[%s5610_s5 + $0x20] sm:$0xff] }
 0x2d7   :  { %3575 = vmatprep.subr.bf16.mxu0 %v3574_v60  ;;  %v2207_v60 = vld [vmem:[%s5610_s5 + $0x30] sm:$0xff] }
 0x2d8   :  { %v3592_v17 = vpack.c.bf16 %v2207_v60, %v2205_v13  ;;  %v3604_v13 = vpack.c.bf16 %v2219_v5, %v2217_v8  ;;  %v3329_v60 = vld [vmem:[%s5610_s5 + $0x560] sm:$0xff]  ;;  %v2240_v8 = vld [vmem:[%s5610_s5 + $0x138] sm:$0xff] }
 0x2da   :  { %3577 = vmatpush1.bf16.msra.mxu0 %v3576_v6 }
 0x2db   :  { %3579 = vmatprep.subr.bf16.mxu0 %v3578_v16 }
 0x2de   :  { %3581 = vmatpush1.bf16.msra.mxu0 %v3580_v34  ;;  %v3317_v34 = vld [vmem:[%s5610_s5 + $0x500] sm:$0xff] }
 0x2df   :  { %3583 = vmatprep.subr.bf16.mxu0 %v3582_v35  ;;  %v3696_v43 = vpack.c.bf16 %v3319_v18, %v3317_v34  ;;  %v3333_v34 = vld [vmem:[%s5610_s5 + $0x580] sm:$0xff]  ;;  %v3335_v18 = vld [vmem:[%s5610_s5 + $0x590] sm:$0xff] }
 0x2e2   :  { %3585 = vmatpush1.bf16.msra.mxu0 %v3584_v37  ;;  %v2216_v37 = vld [vmem:[%s5610_s5 + $0x78] sm:$0xff] }
 0x2e3   :  { %3587 = vmatprep.subr.bf16.mxu0 %v3586_v50  ;;  %v3598_v55 = vpack.c.bf16 %v2216_v37, %v2214_v32  ;;  %v3712_v32 = vpack.c.bf16 %v3335_v18, %v3333_v34  ;;  %v3612_v37 = vpack.c.bf16 %v2227_v31, %v2225_v30  ;;  %v3354_v34 = vld [vmem:[%s5610_s5 + $0x628] sm:$0xff]  ;;  %v2241_v18 = vld [vmem:[%s5610_s5 + $0x140] sm:$0xff]  ;;  %v2248_v30 = vld [vmem:[%s5610_s5 + $0x178] sm:$0xff] }
 0x384   :  { %v5216_v57 = vpop.f32.mrb[78].mxu0 }
 0x385   :  { %v5218_v58 = vpop.f32.mrb[79].mxu0 }
 0x388   :  { %v5220_v38 = vpop.f32.mrb[80].mxu0 }
 0x389   :  { %v5222_v40 = vpop.f32.mrb[81].mxu0  ;;  %v2310_v61 = vrot.slane %v5220_v38, 2 }
 0x38a   :  { %v2313_v44 = vrot.slane %v5222_v40, 2 }
 0x38c   :  { %v2184_v59 = vpop.f32.mrb[82].mxu0 }
 0x38d   :  { %v2311_v62 = vrot.slane %v2184_v59, 2  ;;  %v2186_v63 = vpop.f32.mrb[83].mxu0  ;;  %v2537_v7 = vrot.slane %v2184_v59, 4  ;;  %v2213_v59 = vld [vmem:[%s5610_s5 + $0x60] sm:$0xff] }
 0x38e   :  { %v2314_v3 = vrot.slane %v2186_v63, 2  ;;  %v2540_v22 = vrot.slane %v2186_v63, 4  ;;  %v2220_v63 = vld [vmem:[%s5610_s5 + $0x98] sm:$0xff]  ;;  %v3600_v1 = vpack.c.bf16 %v2215_v52, %v2213_v59  ;;  %v2234_v59 = vld [vmem:[%s5610_s5 + $0x108] sm:$0xff] }
 0x38f   :  { %v2312_v2 = vsel %vm535_vm4, %v2310_v61, %v2311_v62  ;;  %v3328_v61 = vld [vmem:[%s5610_s5 + $0x558] sm:$0xff] }
 0x390   :  { %v2190_v54 = vpop.f32.mrb[84].mxu0  ;;  %v2315_v10 = vsel %vm535_vm4, %v2313_v44, %v2314_v3  ;;  %v3325_v44 = vld [vmem:[%s5610_s5 + $0x540] sm:$0xff]  ;;  %v2236_v52 = vld [vmem:[%s5610_s5 + $0x118] sm:$0xff] }
 0x391   :  { %v2538_v19 = vrot.slane %v2190_v54, 4  ;;  %v2192_v6 = vpop.f32.mrb[85].mxu0  ;;  %3255 = vmatprep.mubr.msk.f32.mxu0 %vm2318_vm9, %v2315_v10  ;;  %v2685_v35 = vrot.slane %v2190_v54, 6  ;;  %v3332_v54 = vld [vmem:[%s5610_s5 + $0x578] sm:$0xff]  ;;  %v2222_v10 = vld [vmem:[%s5610_s5 + $0xa8] sm:$0xff] }
 0x392   :  { %v2541_v15 = vrot.slane %v2192_v6, 4  ;;  %2388 = vmatmul.mubr.f32.vlgmr.msra.gmra.mrb[88].mxu0 %v2312_v2  ;;  %v2688_v42 = vrot.slane %v2192_v6, 6  ;;  %v3702_v2 = vpack.c.bf16 %v3328_v61, %v3326_v56  ;;  %v3344_v56 = vld [vmem:[%s5610_s5 + $0x5d8] sm:$0xff] }
 0x393   :  { %3589 = vmatpush1.bf16.msra.mxu0 %v3588_v46  ;;  %v2539_v16 = vsel %vm552_vm1, %v2537_v7, %v2538_v19  ;;  %3256 = vmatprep.mubr.msk.f32.mxu0 %vm2318_vm9, %v2314_v3  ;;  %v3327_v3 = vld [vmem:[%s5610_s5 + $0x550] sm:$0xff] }
 0x394   :  { %v2542_v25 = vsel %vm552_vm1, %v2540_v22, %v2541_v15  ;;  %3591 = vmatprep.subr.bf16.mxu0 %v3590_v11  ;;  %v5283_v26 = vpop.f32.mrb[86].mxu0  ;;  %v2224_v11 = vld [vmem:[%s5610_s5 + $0xb8] sm:$0xff]  ;;  %v3704_v12 = vpack.c.bf16 %v3327_v3, %v3325_v44  ;;  %v3331_v7 = vld [vmem:[%s5610_s5 + $0x570] sm:$0xff]  ;;  %v3346_v44 = vld [vmem:[%s5610_s5 + $0x5e8] sm:$0xff]  ;;  %vm2974_vm1 = vcmask 261126  }
 0x395   :  { %3311 = vmatprep.mubr.msk.f32.mxu1 %vm2318_vm9, %v2542_v25  ;;  %v2686_v39 = vrot.slane %v5283_v26, 6  ;;  %v5296_v41 = vpop.f32.mrb[87].mxu0  ;;  %v3606_v6 = vpack.c.bf16 %v2224_v11, %v2222_v10  ;;  %v3336_v22 = vld [vmem:[%s5610_s5 + $0x598] sm:$0xff]  ;;  %v2233_v3 = vld [vmem:[%s5610_s5 + $0x100] sm:$0xff]  ;;  %v3347_v11 = vld [vmem:[%s5610_s5 + $0x5f0] sm:$0xff] }
 0x396   :  { %2614 = vmatmul.mubr.f32.vlgmr.msra.gmra.mrb[8].mxu1 %v2539_v16  ;;  %v2689_v45 = vrot.slane %v5296_v41, 6  ;;  %2394 = vmatmul.mubr.f32.gmra.mrb[90].mxu0 %v2311_v62  ;;  %v2218_v62 = vld [vmem:[%s5610_s5 + $0x88] sm:$0xff]  ;;  %v2228_v16 = vld [vmem:[%s5610_s5 + $0xd8] sm:$0xff]  ;;  %v3710_v25 = vpack.c.bf16 %v3336_v22, %v3334_v20  ;;  %v3345_v10 = vld [vmem:[%s5610_s5 + $0x5e0] sm:$0xff] }
 0x397   :  { %3693 = vmatpush1.bf16.msra.mxu1 %v3692_v23  ;;  %3593 = vmatpush1.bf16.msra.mxu0 %v3592_v17  ;;  %v5308_v50 = vsel %vm896_vm6, %v2685_v35, %v2686_v39  ;;  %v3602_v46 = vpack.c.bf16 %v2220_v63, %v2218_v62  ;;  %v3708_v23 = vpack.c.bf16 %v3331_v7, %v3329_v60  ;;  %v2230_v35 = vld [vmem:[%s5610_s5 + $0xe8] sm:$0xff]  ;;  %v3341_v62 = vld [vmem:[%s5610_s5 + $0x5c0] sm:$0xff]  ;;  %v3343_v63 = vld [vmem:[%s5610_s5 + $0x5d0] sm:$0xff] }
 0x398   :  { %3695 = vmatprep.subr.bf16.mxu1 %v3694_v28  ;;  %3595 = vmatprep.subr.bf16.mxu0 %v3594_v29  ;;  %v2690_v53 = vsel %vm896_vm6, %v2688_v42, %v2689_v45  ;;  %v3608_v17 = vpack.c.bf16 %v2223_v21, %v2221_v14  ;;  %v3338_v29 = vld [vmem:[%s5610_s5 + $0x5a8] sm:$0xff]  ;;  %v3337_v42 = vld [vmem:[%s5610_s5 + $0x5a0] sm:$0xff]  ;;  %v3614_v48 = vpack.c.bf16 %v2232_v36, %v2230_v35  ;;  %v2244_v14 = vld [vmem:[%s5610_s5 + $0x158] sm:$0xff] }
 0x399   :  { %3312 = vmatprep.mubr.msk.f32.mxu1 %vm2318_vm9, %v2541_v15  ;;  %3257 = vmatprep.mubr.msk.f32.mxu0 %vm2318_vm9, %v5218_v58  ;;  %v3330_v58 = vld [vmem:[%s5610_s5 + $0x568] sm:$0xff]  ;;  %v3720_v5 = vpack.c.bf16 %v3343_v63, %v3341_v62  ;;  %v2237_v7 = vld [vmem:[%s5610_s5 + $0x120] sm:$0xff]  ;;  %v3724_v21 = vpack.c.bf16 %v3347_v11, %v3345_v10  ;;  %v3355_v36 = vld [vmem:[%s5610_s5 + $0x630] sm:$0xff] }
 0x39a   :  { %2620 = vmatmul.mubr.f32.gmra.mrb[10].mxu1 %v2538_v19  ;;  %v3706_v19 = vpack.c.bf16 %v3332_v54, %v3330_v58  ;;  %v2226_v15 = vld [vmem:[%s5610_s5 + $0xc8] sm:$0xff]  ;;  %v3353_v35 = vld [vmem:[%s5610_s5 + $0x620] sm:$0xff]  ;;  %v2251_v63 = vld [vmem:[%s5610_s5 + $0x190] sm:$0xff] }
 0x39b   :  { %3697 = vmatpush1.bf16.msra.mxu1 %v3696_v43  ;;  %3597 = vmatpush1.bf16.msra.mxu0 %v3596_v47  ;;  %v3610_v28 = vpack.c.bf16 %v2228_v16, %v2226_v15  ;;  %v3339_v43 = vld [vmem:[%s5610_s5 + $0x5b0] sm:$0xff]  ;;  %v3714_v47 = vpack.c.bf16 %v3340_v33, %v3338_v29  ;;  %v2238_v58 = vld [vmem:[%s5610_s5 + $0x128] sm:$0xff]  ;;  %v3349_v15 = vld [vmem:[%s5610_s5 + $0x600] sm:$0xff] }
 0x39c   :  { %3699 = vmatprep.subr.bf16.mxu1 %v3698_v51  ;;  %3599 = vmatprep.subr.bf16.mxu0 %v3598_v55  ;;  %v2229_v51 = vld [vmem:[%s5610_s5 + $0xe0] sm:$0xff]  ;;  %v2231_v55 = vld [vmem:[%s5610_s5 + $0xf0] sm:$0xff]  ;;  %v3350_v60 = vld [vmem:[%s5610_s5 + $0x608] sm:$0xff] }
 0x39d   :  { %3365 = vmatprep.mubr.msk.f32.mxu1 %vm2318_vm9, %v2690_v53  ;;  %v3716_v53 = vpack.c.bf16 %v3339_v43, %v3337_v42  ;;  %v3616_v61 = vpack.c.bf16 %v2231_v55, %v2229_v51  ;;  %v2242_v20 = vld [vmem:[%s5610_s5 + $0x148] sm:$0xff]  ;;  %v3351_v16 = vld [vmem:[%s5610_s5 + $0x610] sm:$0xff]  ;;  %v2245_v43 = vld [vmem:[%s5610_s5 + $0x160] sm:$0xff]  ;;  %v3732_v55 = vpack.c.bf16 %v3355_v36, %v3353_v35 }
 0x39e   :  { %v2246_v29 = vld [vmem:[%s5610_s5 + $0x168] sm:$0xff]  ;;  %v3728_v31 = vpack.c.bf16 %v3351_v16, %v3349_v15  ;;  %v2252_v51 = vld [vmem:[%s5610_s5 + $0x198] sm:$0xff]  ;;  %v2249_v62 = vld [vmem:[%s5610_s5 + $0x180] sm:$0xff] }
 0x39f   :  { %3701 = vmatpush1.bf16.msra.mxu1 %v3700_v0  ;;  %3601 = vmatpush1.bf16.msra.mxu0 %v3600_v1  ;;  %v3718_v0 = vpack.c.bf16 %v3344_v56, %v3342_v49  ;;  %v3618_v1 = vpack.c.bf16 %v2236_v52, %v2234_v59  ;;  %v3358_v42 = vld [vmem:[%s5610_s5 + $0x648] sm:$0xff]  ;;  %v3357_v59 = vld [vmem:[%s5610_s5 + $0x640] sm:$0xff] }
 0x3a0   :  { %3703 = vmatprep.subr.bf16.mxu1 %v3702_v2  ;;  %3603 = vmatprep.subr.bf16.mxu0 %v3602_v46  ;;  %v2235_v2 = vld [vmem:[%s5610_s5 + $0x110] sm:$0xff]  ;;  %v3348_v46 = vld [vmem:[%s5610_s5 + $0x5f8] sm:$0xff]  ;;  %v2250_v49 = vld [vmem:[%s5610_s5 + $0x188] sm:$0xff] }
 0x3a1   :  { %v3620_v54 = vpack.c.bf16 %v2235_v2, %v2233_v3  ;;  %v3636_v3 = vpack.c.bf16 %v2251_v63, %v2249_v62 }
 0x3a3   :  { %3705 = vmatpush1.bf16.msra.mxu1 %v3704_v12  ;;  %3605 = vmatpush1.bf16.msra.mxu0 %v3604_v13  ;;  %v3722_v12 = vpack.c.bf16 %v3348_v46, %v3346_v44  ;;  %v3622_v13 = vpack.c.bf16 %v2240_v8, %v2238_v58  ;;  %v3361_v46 = vld [vmem:[%s5610_s5 + $0x660] sm:$0xff]  ;;  %v3363_v58 = vld [vmem:[%s5610_s5 + $0x670] sm:$0xff] }
 0x3a4   :  { %3707 = vmatprep.subr.bf16.mxu1 %v3706_v19  ;;  %3607 = vmatprep.subr.bf16.mxu0 %v3606_v6  ;;  %v2239_v19 = vld [vmem:[%s5610_s5 + $0x130] sm:$0xff]  ;;  %v3352_v6 = vld [vmem:[%s5610_s5 + $0x618] sm:$0xff]  ;;  %v3740_v8 = vpack.c.bf16 %v3363_v58, %v3361_v46 }
 0x3a5   :  { %v3624_v22 = vpack.c.bf16 %v2239_v19, %v2237_v7 }
 0x3a7   :  { %3709 = vmatpush1.bf16.msra.mxu1 %v3708_v23  ;;  %3609 = vmatpush1.bf16.msra.mxu0 %v3608_v17  ;;  %v3726_v23 = vpack.c.bf16 %v3352_v6, %v3350_v60  ;;  %v3626_v17 = vpack.c.bf16 %v2244_v14, %v2242_v20 }
 0x3a8   :  { %3711 = vmatprep.subr.bf16.mxu1 %v3710_v25  ;;  %3611 = vmatprep.subr.bf16.mxu0 %v3610_v28  ;;  %v2243_v25 = vld [vmem:[%s5610_s5 + $0x150] sm:$0xff]  ;;  %v3356_v28 = vld [vmem:[%s5610_s5 + $0x638] sm:$0xff] }
 0x3a9   :  { %v3628_v33 = vpack.c.bf16 %v2243_v25, %v2241_v18  ;;  %v2802_v25 = vld [vmem:[%s5614_s7] sm:$0xff] }
 0x3ab   :  { %3713 = vmatpush1.bf16.msra.mxu1 %v3712_v32  ;;  %3613 = vmatpush1.bf16.msra.mxu0 %v3612_v37  ;;  %v3730_v32 = vpack.c.bf16 %v3356_v28, %v3354_v34  ;;  %v3630_v37 = vpack.c.bf16 %v2248_v30, %v2246_v29  ;;  %v2884_v28 = vld [vmem:[%s5615_s8] sm:$0x3]  ;;  %v3372_v29 = vld [vmem:[%s5615_s8 + $0x6] sm:$0x3]  ;;  %v3370_v30 = vld [vmem:[%s5615_s8 + $0x2] sm:$0x3] }
 0x3ac   :  { %3715 = vmatprep.subr.bf16.mxu1 %v3714_v47  ;;  %3615 = vmatprep.subr.bf16.mxu0 %v3614_v48  ;;  %v2247_v47 = vld [vmem:[%s5610_s5 + $0x170] sm:$0xff]  ;;  %v3360_v48 = vld [vmem:[%s5610_s5 + $0x658] sm:$0xff]  ;;  %v2889_v35 = vrot.slane %v2884_v28, %v4975_v24  ;;  %v2963_v36 = vrot.slane %v3372_v29, %v4975_v24 }
 0x3ad   :  { %v3632_v56 = vpack.c.bf16 %v2247_v47, %v2245_v43  ;;  %v3734_v52 = vpack.c.bf16 %v3360_v48, %v3358_v42  ;;  %v2915_v42 = vrot.slane %v3370_v30, %v4980_v27  ;;  %v2941_v43 = vrot.slane %v3371_v9, %v4980_v27 }
 0x3af   :  { %3717 = vmatpush1.bf16.msra.mxu1 %v3716_v53  ;;  %3617 = vmatpush1.bf16.msra.mxu0 %v3616_v61  ;;  %v3359_v53 = vld [vmem:[%s5610_s5 + $0x650] sm:$0xff]  ;;  %v3634_v61 = vpack.c.bf16 %v2252_v51, %v2250_v49 }
 0x3b0   :  { %3719 = vmatprep.subr.bf16.mxu1 %v3718_v0  ;;  %3619 = vmatprep.subr.bf16.mxu0 %v3618_v1  ;;  %v3362_v0 = vld [vmem:[%s5610_s5 + $0x668] sm:$0xff]  ;;  %v3364_v1 = vld [vmem:[%s5610_s5 + $0x678] sm:$0xff]  ;;  %v3736_v44 = vpack.c.bf16 %v3359_v53, %v3357_v59 }
 0x3b1   :  { %v3738_v2 = vpack.c.bf16 %v3364_v1, %v3362_v0 }
 0x3b3   :  { %3721 = vmatpush1.bf16.msra.mxu1 %v3720_v5  ;;  %3621 = vmatpush1.bf16.msra.mxu0 %v3620_v54 }
 0x3b4   :  { %3723 = vmatprep.subr.bf16.mxu1 %v3722_v12  ;;  %3623 = vmatprep.subr.bf16.mxu0 %v3622_v13 }
 0x3b7   :  { %3725 = vmatpush1.bf16.msra.mxu1 %v3724_v21  ;;  %3625 = vmatpush1.bf16.msra.mxu0 %v3624_v22 }
 0x3b8   :  { %3727 = vmatprep.subr.bf16.mxu1 %v3726_v23  ;;  %3627 = vmatprep.subr.bf16.mxu0 %v3626_v17 }
 0x3bb   :  { %3729 = vmatpush1.bf16.msra.mxu1 %v3728_v31  ;;  %3629 = vmatpush1.bf16.msra.mxu0 %v3628_v33  ;;  %v2911_v31 = vrot.slane %v3370_v30, %v4975_v24  ;;  %v2937_v33 = vrot.slane %v3371_v9, %v4975_v24 }
 0x3bc   :  { %3731 = vmatprep.subr.bf16.mxu1 %v3730_v32  ;;  %3631 = vmatprep.subr.bf16.mxu0 %v3630_v37  ;;  %v2893_v32 = vrot.slane %v2884_v28, %v4980_v27  ;;  %v2967_v37 = vrot.slane %v3372_v29, %v4980_v27 }
 0x3bf   :  { %3733 = vmatpush1.bf16.msra.mxu1 %v3732_v55  ;;  %3633 = vmatpush1.bf16.msra.mxu0 %v3632_v56 }
 0x3c0   :  { %3735 = vmatprep.subr.bf16.mxu1 %v3734_v52  ;;  %3635 = vmatprep.subr.bf16.mxu0 %v3634_v61 }
 0x3c3   :  { %3737 = vmatpush1.bf16.msra.mxu1 %v3736_v44  ;;  %3637 = vmatpush1.bf16.msra.mxu0 %v3636_v3 }
 0x3c4   :  { %3739 = vmatprep.subr.bf16.mxu1 %v3738_v2 }
 0x3c6   :  { %2470 = vmatmul.mubr.f32.vlgmr.msra.gmra.mrb[88].mxu0 %v5216_v57  ;;  %v2778_v57 = vld [vmem:[%s5613_s6] sm:$0x3] }
 0x3c7   :  { %3741 = vmatpush1.bf16.msra.mxu1 %v3740_v8  ;;  %3258 = vmatprep.mubr.msk.f32.mxu0 %vm2318_vm9, %v5222_v40  ;;  %v2783_v40 = vrot.slane %v2778_v57, %v4975_v24 }
 0x3ca   :  { %2762 = vmatmul.mubr.f32.vlgmr.msra.gmra.mrb[8].mxu1 %v5308_v50  ;;  %2476 = vmatmul.mubr.f32.gmra.mrb[90].mxu0 %v5220_v38  ;;  %v2787_v38 = vrot.slane %v2778_v57, %v4980_v27 }
 0x3cb   :  { %3366 = vmatprep.mubr.msk.f32.mxu1 %vm2318_vm9, %v2689_v45 }
 0x3ce   :  { %2768 = vmatmul.mubr.f32.gmra.mrb[10].mxu1 %v2686_v39 }
 0x3cf   :  { %2877 = vmatprep.mubr.f32.mxu1 %v3852_v4 }
 0x499   :  { %v2471_v5 = vpop.f32.mrb[88].mxu0 }
 0x49a   :  { %v2473_v54 = vpop.f32.mrb[89].mxu0 }
 0x49d   :  { %v2763_v50 = vpop.f32.mrb[8].mxu1  ;;  %v2477_v10 = vpop.f32.mrb[90].mxu0 }
 0x49e   :  { %v3748_v41 = vadd.f32 %v2763_v50, %v2471_v5  ;;  %v2765_v11 = vpop.f32.mrb[9].mxu1  ;;  %v2479_v45 = vpop.f32.mrb[91].mxu0  ;;  %v15_v5 = vstv %s5616_s9 }
 0x49f   :  { %v3749_v12 = vadd.f32 %v2765_v11, %v2473_v54  ;;  %16 = vst [vmem:[#allocation2] sm:$0x1] %v15_v5 }
 0x4a0   :  { %v2790_v26 = vadd.f32 %v3748_v41, %v2783_v40 }
 0x4a1   :  { %v2791_v39 = vadd.f32 %v3749_v12, %v2787_v38  ;;  %v2769_v13 = vpop.f32.mrb[10].mxu1 }
 0x4a2   :  { %v3750_v4 = vadd.f32 %v2769_v13, %v2477_v10  ;;  %v2771_v60 = vpop.f32.mrb[11].mxu1  ;;  %v2794_v19 = vmul.f32 0.2, %v2790_v26 }
 0x4a3   :  { %v3751_v7 = vadd.f32 %v2771_v60, %v2479_v45  ;;  %v2795_v20 = vmul.f32 0.2, %v2791_v39 }
 0x4a4   :  { %v2792_v6 = vadd.f32 %v3750_v4, %v2783_v40  ;;  %v2798_v15 = vmax.f32 %v2790_v26, %v2794_v19 }
 0x4a5   :  { %v2793_v14 = vadd.f32 %v3751_v7, %v2787_v38  ;;  %v2799_v23 = vmax.f32 %v2791_v39, %v2795_v20 }
 0x4a6   :  { %v2796_v21 = vmul.f32 0.2, %v2792_v6  ;;  %v3373_v12 = vld [vmem:[#allocation2] ss:$0 sm:$0xff] }
 0x4a7   :  { %v2797_v22 = vmul.f32 0.2, %v2793_v14 }
 0x4a8   :  { %v2800_v16 = vmax.f32 %v2792_v6, %v2796_v21 }
 0x4a9   :  { %v2801_v17 = vmax.f32 %v2793_v14, %v2797_v22 }
 0x4aa   :  { %v3745_v34 = vpack.c.bf16 %v2800_v16, %v2798_v15 }
 0x4ab   :  { %v3742_v18 = vpack.c.bf16 %v2801_v17, %v2799_v23 }
 0x4ad   :  { %3744 = vmatprep.subr.msk.bf16.mxu1 %vm4992_vm7, %v3742_v18 }
 0x4ae   :  { %3747 = vmatpush1.bf16.msk.msra.mxu1 %vm4992_vm7, %v3745_v34 }
 0x4b1   :  { %3369 = vmatmul.mubr.msk.f32.vlgmr.msra.gmra.mrb[12].mxu1 %vm2803_vm10, %v2802_v25 }
 0x584   :  { %v2879_v47 = vpop.f32.mrb[12].mxu1 }
 0x585   :  { %v2881_v48 = vpop.f32.mrb[13].mxu1  ;;  %v2918_v49 = vmul.f32 %v2911_v31, %v2879_v47  ;;  %v2944_v51 = vmul.f32 %v2937_v33, %v2879_v47  ;;  %v2896_v24 = vmul.f32 %v2889_v35, %v2879_v47  ;;  %v2970_v55 = vmul.f32 %v2963_v36, %v2879_v47 }
 0x586   :  { %v2897_v56 = vmul.f32 %v2893_v32, %v2881_v48  ;;  %v2971_v59 = vmul.f32 %v2967_v37, %v2881_v48  ;;  %v2919_v52 = vmul.f32 %v2915_v42, %v2881_v48  ;;  %v2945_v53 = vmul.f32 %v2941_v43, %v2881_v48 }
 0x587   :  { %v2921_v61 = vsel %vm2920_vm11, %v2918_v49, 0.0  ;;  %v2947_v27 = vsel %vm2946_vm13, %v2944_v51, 0.0  ;;  %v2898_v62 = vsel %vm896_vm6, %v2896_v24, 0.0  ;;  %v2973_v63 = vsel %vm2972_vm0, %v2970_v55, 0.0 }
 0x588   :  { %v2923_v0 = vsel %vm2922_vm12, %v2919_v52, 0.0  ;;  %v2949_v1 = vsel %vm2948_vm14, %v2945_v53, 0.0  ;;  %v2900_v44 = vsel %vm2899_vm15, %v2897_v56, 0.0  ;;  %v2975_v3 = vsel %vm2974_vm1, %v2971_v59, 0.0 }
 0x589   :  { %v2924_v2 = vadd.f32 %v2923_v0, %v2921_v61  ;;  %v2950_v46 = vadd.f32 %v2949_v1, %v2947_v27  ;;  %v2901_v58 = vadd.f32 %v2900_v44, %v2898_v62  ;;  %v2976_v8 = vadd.f32 %v2975_v3, %v2973_v63 }
 0x58b   :  { %2925 = vadd.xlane.f32.xlu0 %v2924_v2  ;;  %2951 = vadd.xlane.f32.xlu1 %v2950_v46 }
 0x58f   :  { %2902 = vadd.xlane.f32.xlu0 %v2901_v58  ;;  %2977 = vadd.xlane.f32.xlu1 %v2976_v8 }
 0x618   :  { %v2926_v57 = vpop.xlane.xlu0 %2925  ;;  %v2952_v54 = vpop.xlane.xlu1 %2951 }
 0x619   :  { %v2928_v40 = vrot.slane %v2926_v57, 2  ;;  %v2954_v10 = vrot.slane %v2952_v54, 4 }
 0x61c   :  { %v2903_v50 = vpop.xlane.xlu0 %2902  ;;  %v2978_v38 = vpop.xlane.xlu1 %2977 }
 0x61d   :  { %v2930_v41 = vadd.f32 %v2928_v40, %v2903_v50  ;;  %v2980_v45 = vrot.slane %v2978_v38, 6 }
 0x61f   :  { %v2956_v11 = vadd.f32 %v2954_v10, %v2930_v41 }
 0x621   :  { %v2982_v26 = vadd.f32 %v2980_v45, %v2956_v11 }
 0x623   :  { %v2990_v39 = vadd.f32 %v3373_v12, %v2982_v26 }
 0x625   :  { %2992 = vst.msk [vmem:[%s5617_s10] sm:$0x3] %vm2991_vm2, %v2990_v39 }

</bundles_post_ra>
